<compile_context>
chip_gen: v7x
topology: tpu7x:2x2x1
jax: 0.10.0
libtpu: 0.0.40
codegen_flags: <defaults>
</compile_context>

<pallas_src>
import jax
import jax.numpy as jnp
from jax.experimental import pallas as pl
from jax.experimental.pallas import tpu as pltpu


# ----------------------------- configuration --------------------------------
NUM_JOINTS = 8
NUM_FEATS = 5
NUM_XYZ = 3
NUM_CHANNELS = 32            # small test config (module default is 1024)
NUM_RES_BLOCKS = 2
INPUT_SIZE = NUM_JOINTS * NUM_FEATS          # 40
BN_EPS = 1e-5

BATCH = 256
TM = 256                     # batch tile; grid = ceil(BATCH/TM) = 1

C = NUM_CHANNELS
J = NUM_JOINTS
LANE = 128


def _ru(x, m):
    return ((x + m - 1) // m) * m


# ----- packed-slab geometry (every column group starts on a 128-lane boundary) -----
CGW = _ru(C, LANE)                          # 128  width of a C-column group
HX = (NUM_XYZ + 1) * C                      # 128  branch activations incl. x-carry lanes
HXW = _ru(HX, LANE)                         # 128
OUTW = _ru(NUM_XYZ * NUM_JOINTS, LANE)      # 128  lane-dense padded output width
JINW = _ru(INPUT_SIZE + 1, LANE)            # 128  padded input (constant-1 lane at INPUT_SIZE)
SLAB_ROWS = max(JINW, HX, CGW)              # 128

# Section A: jin-side weights (pre + blocks + branches), biases in row INPUT_SIZE
_A_BR = (1 + NUM_RES_BLOCKS) * CGW                       # 384
_JALL_COLS = _A_BR + HXW                                 # 512
# Section B: C-row weights (per-block w1x, w2; branch [w1x_br | I_C])
_B = _JALL_COLS                                          # 512
_B_BR1 = _B + NUM_RES_BLOCKS * 2 * CGW                   # 1024
# Section C: block-diag(w2_br0.T, w2_br1.T, w2_br2.T, I_C)
_C_W2BD = _B_BR1 + HXW                                   # 1152
# Section D: fused final output weight (per-branch residual folded, zero-padded to 128 cols)
_D_FIN = _C_W2BD + HXW                                   # 1280
# Section E: remaining biases (block b2's, branch b2's, bo), zero-padded groups
_E = _D_FIN + OUTW                                       # 1408
_E_B2BR = _E + NUM_RES_BLOCKS * CGW                      # 1664
_E_BO = _E_B2BR + HXW                                    # 1792
_P_COLS = _E_BO + OUTW                                   # 1920

assert HX <= SLAB_ROWS and JINW <= SLAB_ROWS
assert SLAB_ROWS % 8 == 0 and _P_COLS % LANE == 0


# ------------------------------- kernel --------------------------------------
def lifter_kernel(j_ref, w_ref, out_ref):
    jin = j_ref[...]                                   # (TM, 128); col 40 == 1.0 (bias lane)

    # (1) every joints_in-side projection (pre + all first-layer linears) in ONE
    #     K=128 matmul; all their (BN-folded) biases are folded into weight row
    #     INPUT_SIZE via the constant-1 input lane.  Column groups are 128-aligned.
    jall = jnp.dot(jin, w_ref[0:JINW, 0:_JALL_COLS],
                   preferred_element_type=jnp.float32)             # (TM, 512)

    # pre: Linear + folded-BN + ReLU (Dropout eval = identity)
    x = jnp.maximum(jall[:, 0:C], 0.0)                             # (TM, 32)

    # (2) sequential residual blocks (unrolled; all slices start on lane-tile boundaries)
    for i in range(NUM_RES_BLOCKS):
        w1x = w_ref[0:C, _B + 2 * i * CGW:_B + 2 * i * CGW + C]          # (C, C)
        w2 = w_ref[0:C, _B + (2 * i + 1) * CGW:_B + (2 * i + 1) * CGW + C]
        jp = jall[:, (1 + i) * CGW:(1 + i) * CGW + C]                    # jin@w1j + b1
        b2 = w_ref[0:1, _E + i * CGW:_E + i * CGW + C]                   # (1, C)
        h = jnp.maximum(jnp.dot(x, w1x, preferred_element_type=jnp.float32) + jp, 0.0)
        h = jnp.maximum(jnp.dot(h, w2, preferred_element_type=jnp.float32) + b2, 0.0)
        x = x + h

    # (3) the three branches fused.  x (always >= 0, so ReLU(x) == x) is carried
    #     through lanes [3C, 4C) by identity blocks baked into the packed weights,
    #     so the per-branch residual and the three output linears collapse into a
    #     single final K=128 matmul emitting a lane-dense (TM, 128) output slab
    #     (real data in cols [0, 24), the torch.cat([x, y, z], -1) layout).
    w1w = w_ref[0:C, _B_BR1:_B_BR1 + HX]              # (32, 128)  [w1x_br | I_C]
    w2w = w_ref[0:HX, _C_W2BD:_C_W2BD + HX]           # (128,128)  blockdiag(w2_br*, I_C)
    wfin = w_ref[0:HX, _D_FIN:_D_FIN + OUTW]          # (128,128)  [Wo_bd ; Wo_cat], 0-padded
    jpw = jall[:, _A_BR:_A_BR + HX]                   # (TM, 128)  jin@w1j + b1; x-lanes = 0
    b2w = w_ref[0:1, _E_B2BR:_E_B2BR + HX]            # (1, 128)   x-lanes = 0
    bo = w_ref[0:1, _E_BO:_E_BO + OUTW]               # (1, 128)   cols >= 24 are 0

    h = jnp.maximum(jnp.dot(x, w1w, preferred_element_type=jnp.float32) + jpw, 0.0)
    h = jnp.maximum(jnp.dot(h, w2w, preferred_element_type=jnp.float32) + b2w, 0.0)
    out_ref[...] = jnp.dot(h, wfin, preferred_element_type=jnp.float32) + bo


# --------------------------- parameter setup (glue) ---------------------------
def _fold_bn(w, b, gamma, beta, mean, var, eps=BN_EPS):
    """Fold eval-mode BatchNorm1d into the preceding Linear.  w: (out, in)."""
    s = gamma / jnp.sqrt(var + eps)
    return w * s[:, None], b * s + (beta - mean * s)


def _linear_bn_params(key, in_dim, out_dim):
    kw, kb = jax.random.split(key)
    w = jax.random.normal(kw, (out_dim, in_dim), jnp.float32) * 0.02
    b = jax.random.normal(kb, (out_dim,), jnp.float32) * 0.02
    gamma = jnp.ones((out_dim,), jnp.float32)
    beta = jnp.zeros((out_dim,), jnp.float32)
    mean = jnp.zeros((out_dim,), jnp.float32)
    var = jnp.ones((out_dim,), jnp.float32)
    return _fold_bn(w, b, gamma, beta, mean, var)


def _linear_params(key, in_dim, out_dim):
    kw, kb = jax.random.split(key)
    w = jax.random.normal(kw, (out_dim, in_dim), jnp.float32) * 0.02
    b = jax.random.normal(kb, (out_dim,), jnp.float32) * 0.02
    return w, b


def init_lifter_params(key):
    """Per-layer (BN-folded) params in torch layout:  w: (out, in), b: (out,)."""
    F = INPUT_SIZE
    keys = jax.random.split(key, 1 + NUM_RES_BLOCKS + NUM_XYZ)

    wpre, bpre = _linear_bn_params(keys[0], F, C)

    blocks = []
    for i in range(NUM_RES_BLOCKS):
        k1, k2 = jax.random.split(keys[1 + i])
        w1, b1 = _linear_bn_params(k1, C + F, C)     # concat order = [x, joints_in]
        w2, b2 = _linear_bn_params(k2, C, C)
        blocks.append((w1, b1, w2, b2))

    branches = []
    for k in range(NUM_XYZ):
        kb, ko = jax.random.split(keys[1 + NUM_RES_BLOCKS + k])
        k1, k2 = jax.random.split(kb)
        w1, b1 = _linear_bn_params(k1, C + F, C)
        w2, b2 = _linear_bn_params(k2, C, C)
        wo, bo = _linear_params(ko, C, J)
        branches.append((w1, b1, w2, b2, wo, bo))

    return (wpre, bpre, blocks, branches)


def pack_params(raw):
    """Pack every layer into ONE (128, 1920) kernel-ready slab (128-lane-aligned groups)."""
    wpre, bpre, blocks, branches = raw
    F = INPUT_SIZE
    W = jnp.zeros((SLAB_ROWS, _P_COLS), jnp.float32)
    eye_c = jnp.eye(C, dtype=jnp.float32)

    def xw(w1):   # x-side weight, (C, C), laid out for x @ W
        return w1[:, :C].T

    def jw(w1):   # jin-side weight, (F, C)
        return w1[:, C:].T

    # --- Section A: jin-side weights; folded biases go in row F (constant-1 lane) ---
    W = W.at[0:F, 0:C].set(wpre.T)
    W = W.at[F, 0:C].set(bpre)
    for i, (w1, b1, _, _) in enumerate(blocks):
        off = (1 + i) * CGW
        W = W.at[0:F, off:off + C].set(jw(w1))
        W = W.at[F, off:off + C].set(b1)
    for k, (w1, b1, _, _, _, _) in enumerate(branches):
        off = _A_BR + k * C
        W = W.at[0:F, off:off + C].set(jw(w1))
        W = W.at[F, off:off + C].set(b1)

    # --- Section B: C-row weights -------------------------------------------------
    for i, (w1, _, w2, _) in enumerate(blocks):
        W = W.at[0:C, _B + 2 * i * CGW:_B + 2 * i * CGW + C].set(xw(w1))
        W = W.at[0:C, _B + (2 * i + 1) * CGW:_B + (2 * i + 1) * CGW + C].set(w2.T)
    for k, (w1, _, _, _, _, _) in enumerate(branches):
        W = W.at[0:C, _B_BR1 + k * C:_B_BR1 + (k + 1) * C].set(xw(w1))
    W = W.at[0:C, _B_BR1 + NUM_XYZ * C:_B_BR1 + HX].set(eye_c)      # carry x -> lanes [3C,4C)

    # --- Section C: blockdiag(w2_br0.T, w2_br1.T, w2_br2.T, I_C) ------------------
    for k, (_, _, w2, _, _, _) in enumerate(branches):
        W = W.at[k * C:(k + 1) * C, _C_W2BD + k * C:_C_W2BD + (k + 1) * C].set(w2.T)
    W = W.at[NUM_XYZ * C:HX, _C_W2BD + NUM_XYZ * C:_C_W2BD + HX].set(eye_c)

    # --- Section D: fused final output weight (per-branch residual folded) --------
    # out[:, 8k:8k+8] = (h2_k + x) @ wo_k.T + bo_k ; cols >= 24 stay zero (lane-dense pad).
    for k, (_, _, _, _, wo, _) in enumerate(branches):
        W = W.at[k * C:(k + 1) * C, _D_FIN + k * J:_D_FIN + (k + 1) * J].set(wo.T)
        W = W.at[NUM_XYZ * C:HX, _D_FIN + k * J:_D_FIN + (k + 1) * J].set(wo.T)

    # --- Section E: remaining biases ----------------------------------------------
    for i, (_, _, _, b2) in enumerate(blocks):
        W = W.at[0, _E + i * CGW:_E + i * CGW + C].set(b2)
    for k, (_, _, _, b2, _, _) in enumerate(branches):
        W = W.at[0, _E_B2BR + k * C:_E_B2BR + (k + 1) * C].set(b2)   # x-carry lanes stay 0
    for k, (_, _, _, _, _, bo) in enumerate(branches):
        W = W.at[0, _E_BO + k * J:_E_BO + (k + 1) * J].set(bo)       # cols >= 24 stay 0

    return W


# -------------------------- pure-JAX reference --------------------------------
def lifter_reference(joints_2d, raw):
    wpre, bpre, blocks, branches = raw
    bs = joints_2d.shape[0]
    jin = joints_2d.reshape(bs, -1).astype(jnp.float32)
    x = jax.nn.relu(jin @ wpre.T + bpre)

    def res_block(x, w1, b1, w2, b2):
        h = jax.nn.relu(jnp.concatenate([x, jin], axis=-1) @ w1.T + b1)
        h = jax.nn.relu(h @ w2.T + b2)
        return x + h

    for (w1, b1, w2, b2) in blocks:
        x = res_block(x, w1, b1, w2, b2)
    ys = []
    for (w1, b1, w2, b2, wo, bo) in branches:
        xb = res_block(x, w1, b1, w2, b2)
        ys.append(xb @ wo.T + bo)
    out = jnp.concatenate(ys, axis=-1)
    return out.reshape(bs, NUM_JOINTS, NUM_XYZ)


# ------------------------------- wrapper --------------------------------------
def _round_up(x, m):
    return ((x + m - 1) // m) * m


@jax.jit
def lifter_forward(joints_2d, w_slab):
    bs = joints_2d.shape[0]
    jin = joints_2d.reshape(bs, -1).astype(jnp.float32)            # (bs, 40)
    # append the constant-1 bias lane and zero-pad to a full 128-lane vreg width
    jin = jnp.concatenate(
        [jin,
         jnp.ones((bs, 1), jnp.float32),
         jnp.zeros((bs, JINW - INPUT_SIZE - 1), jnp.float32)], axis=-1)   # (bs, 128)

    tm = min(TM, _round_up(bs, 8))
    bs_pad = _round_up(bs, tm)
    if bs_pad != bs:
        jin = jnp.pad(jin, ((0, bs_pad - bs), (0, 0)))

    out_pad = pl.pallas_call(
        lifter_kernel,
        out_shape=jax.ShapeDtypeStruct((bs_pad, OUTW), jnp.float32),   # lane-dense (.., 128)
        grid=(bs_pad // tm,),
        in_specs=[
            pl.BlockSpec((tm, JINW), lambda i: (i, 0)),
            # single constant-index ~1 MiB parameter slab -> one weight DMA per call
            pl.BlockSpec((SLAB_ROWS, _P_COLS), lambda i: (0, 0)),
        ],
        out_specs=pl.BlockSpec((tm, OUTW), lambda i: (i, 0)),
        compiler_params=pltpu.CompilerParams(
            dimension_semantics=("parallel",)),
    )(jin, w_slab)

    # strip the lane padding (cols >= 24 are exact zeros) and the batch padding,
    # then reshape exactly like torch.cat(xyz, -1).view(bs, num_joints, num_xyz)
    out = out_pad[:bs, :NUM_XYZ * NUM_JOINTS]
    return out.reshape(bs, NUM_JOINTS, NUM_XYZ)


# -------------------------------- main ----------------------------------------
if __name__ == "__main__":
    key = jax.random.PRNGKey(0)
    k_in, k_par = jax.random.split(key)

    joints_2d = jax.random.normal(k_in, (BATCH, NUM_JOINTS, NUM_FEATS), jnp.float32)
    raw = init_lifter_params(k_par)
    w_slab = pack_params(raw)

    out = jax.block_until_ready(lifter_forward(joints_2d, w_slab))
    ref = jax.block_until_ready(lifter_reference(joints_2d, raw))

    assert out.shape == (BATCH, NUM_JOINTS, NUM_XYZ)
    assert bool(jnp.all(jnp.isfinite(out)))
    err = float(jnp.max(jnp.abs(out - ref)))
    assert bool(jnp.allclose(out, ref, atol=1e-3, rtol=1e-3)), "max abs err = %g" % err
    print("KERNEL_OK")
</pallas_src>

<mosaic_0001>
module attributes {stable_mosaic.version = 11 : i64} {
  func.func @lifter_kernel(%arg0: i32, %arg1: memref<256x128xf32, #tpu.memory_space<vmem>>, %arg2: memref<128x1920xf32, #tpu.memory_space<vmem>>, %arg3: memref<256x128xf32, #tpu.memory_space<vmem>>) attributes {dimension_semantics = [#tpu.dimension_semantics<parallel>], iteration_bounds = array<i64: 1>, scalar_prefetch = 0 : i64, scratch_operands = 0 : i64, tpu.core_type = #tpu.core_type<tc>, window_params = [{transform_indices = @transform_0, window_bounds = array<i64: 256, 128>}, {pipeline_mode = #tpu.pipeline_mode<synchronous>, transform_indices = @transform_1, window_bounds = array<i64: 128, 1920>}, {transform_indices = @transform_2, window_bounds = array<i64: 256, 128>}]} {
    %c0 = arith.constant 0 : index
    %c0_0 = arith.constant 0 : index
    %0 = vector.load %arg1[%c0, %c0_0] : memref<256x128xf32, #tpu.memory_space<vmem>>, vector<256x128xf32>
    %c0_1 = arith.constant 0 : index
    %c0_2 = arith.constant 0 : index
    %1 = vector.load %arg2[%c0_1, %c0_2] : memref<128x1920xf32, #tpu.memory_space<vmem>>, vector<128x512xf32>
    %cst = arith.constant dense<0.000000e+00> : vector<256x512xf32>
    %2 = tpu.matmul %0, %1, %cst {dimension_numbers = #tpu.dot_dimension_numbers<[1], [0], [0], [1], [0, 0, 1, 1], [], []>} : vector<256x128xf32>, vector<128x512xf32>, vector<256x512xf32> -> vector<256x512xf32>
    %3 = vector.extract_strided_slice %2 {offsets = [0, 0], sizes = [256, 32], strides = [1, 1]} : vector<256x512xf32> to vector<256x32xf32>
    %cst_3 = arith.constant 0.000000e+00 : f32
    %4 = vector.broadcast %cst_3 : f32 to vector<256x32xf32>
    %5 = arith.maximumf %3, %4 : vector<256x32xf32>
    %c0_4 = arith.constant 0 : index
    %c512 = arith.constant 512 : index
    %6 = vector.load %arg2[%c0_4, %c512] : memref<128x1920xf32, #tpu.memory_space<vmem>>, vector<32x32xf32>
    %c0_5 = arith.constant 0 : index
    %c640 = arith.constant 640 : index
    %7 = vector.load %arg2[%c0_5, %c640] : memref<128x1920xf32, #tpu.memory_space<vmem>>, vector<32x32xf32>
    %8 = vector.extract_strided_slice %2 {offsets = [0, 128], sizes = [256, 32], strides = [1, 1]} : vector<256x512xf32> to vector<256x32xf32>
    %c0_6 = arith.constant 0 : index
    %c1408 = arith.constant 1408 : index
    %9 = vector.load %arg2[%c0_6, %c1408] : memref<128x1920xf32, #tpu.memory_space<vmem>>, vector<1x32xf32>
    %cst_7 = arith.constant dense<0.000000e+00> : vector<256x32xf32>
    %10 = tpu.matmul %5, %6, %cst_7 {dimension_numbers = #tpu.dot_dimension_numbers<[1], [0], [0], [1], [0, 0, 1, 1], [], []>} : vector<256x32xf32>, vector<32x32xf32>, vector<256x32xf32> -> vector<256x32xf32>
    %11 = arith.addf %10, %8 : vector<256x32xf32>
    %cst_8 = arith.constant 0.000000e+00 : f32
    %12 = vector.broadcast %cst_8 : f32 to vector<256x32xf32>
    %13 = arith.maximumf %11, %12 : vector<256x32xf32>
    %cst_9 = arith.constant dense<0.000000e+00> : vector<256x32xf32>
    %14 = tpu.matmul %13, %7, %cst_9 {dimension_numbers = #tpu.dot_dimension_numbers<[1], [0], [0], [1], [0, 0, 1, 1], [], []>} : vector<256x32xf32>, vector<32x32xf32>, vector<256x32xf32> -> vector<256x32xf32>
    %15 = vector.broadcast %9 : vector<1x32xf32> to vector<256x32xf32>
    %16 = arith.addf %14, %15 : vector<256x32xf32>
    %cst_10 = arith.constant 0.000000e+00 : f32
    %17 = vector.broadcast %cst_10 : f32 to vector<256x32xf32>
    %18 = arith.maximumf %16, %17 : vector<256x32xf32>
    %19 = arith.addf %5, %18 : vector<256x32xf32>
    %c0_11 = arith.constant 0 : index
    %c768 = arith.constant 768 : index
    %20 = vector.load %arg2[%c0_11, %c768] : memref<128x1920xf32, #tpu.memory_space<vmem>>, vector<32x32xf32>
    %c0_12 = arith.constant 0 : index
    %c896 = arith.constant 896 : index
    %21 = vector.load %arg2[%c0_12, %c896] : memref<128x1920xf32, #tpu.memory_space<vmem>>, vector<32x32xf32>
    %22 = vector.extract_strided_slice %2 {offsets = [0, 256], sizes = [256, 32], strides = [1, 1]} : vector<256x512xf32> to vector<256x32xf32>
    %c0_13 = arith.constant 0 : index
    %c1536 = arith.constant 1536 : index
    %23 = vector.load %arg2[%c0_13, %c1536] : memref<128x1920xf32, #tpu.memory_space<vmem>>, vector<1x32xf32>
    %cst_14 = arith.constant dense<0.000000e+00> : vector<256x32xf32>
    %24 = tpu.matmul %19, %20, %cst_14 {dimension_numbers = #tpu.dot_dimension_numbers<[1], [0], [0], [1], [0, 0, 1, 1], [], []>} : vector<256x32xf32>, vector<32x32xf32>, vector<256x32xf32> -> vector<256x32xf32>
    %25 = arith.addf %24, %22 : vector<256x32xf32>
    %cst_15 = arith.constant 0.000000e+00 : f32
    %26 = vector.broadcast %cst_15 : f32 to vector<256x32xf32>
    %27 = arith.maximumf %25, %26 : vector<256x32xf32>
    %cst_16 = arith.constant dense<0.000000e+00> : vector<256x32xf32>
    %28 = tpu.matmul %27, %21, %cst_16 {dimension_numbers = #tpu.dot_dimension_numbers<[1], [0], [0], [1], [0, 0, 1, 1], [], []>} : vector<256x32xf32>, vector<32x32xf32>, vector<256x32xf32> -> vector<256x32xf32>
    %29 = vector.broadcast %23 : vector<1x32xf32> to vector<256x32xf32>
    %30 = arith.addf %28, %29 : vector<256x32xf32>
    %cst_17 = arith.constant 0.000000e+00 : f32
    %31 = vector.broadcast %cst_17 : f32 to vector<256x32xf32>
    %32 = arith.maximumf %30, %31 : vector<256x32xf32>
    %33 = arith.addf %19, %32 : vector<256x32xf32>
    %c0_18 = arith.constant 0 : index
    %c1024 = arith.constant 1024 : index
    %34 = vector.load %arg2[%c0_18, %c1024] : memref<128x1920xf32, #tpu.memory_space<vmem>>, vector<32x128xf32>
    %c0_19 = arith.constant 0 : index
    %c1152 = arith.constant 1152 : index
    %35 = vector.load %arg2[%c0_19, %c1152] : memref<128x1920xf32, #tpu.memory_space<vmem>>, vector<128x128xf32>
    %c0_20 = arith.constant 0 : index
    %c1280 = arith.constant 1280 : index
    %36 = vector.load %arg2[%c0_20, %c1280] : memref<128x1920xf32, #tpu.memory_space<vmem>>, vector<128x128xf32>
    %37 = vector.extract_strided_slice %2 {offsets = [0, 384], sizes = [256, 128], strides = [1, 1]} : vector<256x512xf32> to vector<256x128xf32>
    %c0_21 = arith.constant 0 : index
    %c1664 = arith.constant 1664 : index
    %38 = vector.load %arg2[%c0_21, %c1664] : memref<128x1920xf32, #tpu.memory_space<vmem>>, vector<1x128xf32>
    %c0_22 = arith.constant 0 : index
    %c1792 = arith.constant 1792 : index
    %39 = vector.load %arg2[%c0_22, %c1792] : memref<128x1920xf32, #tpu.memory_space<vmem>>, vector<1x128xf32>
    %cst_23 = arith.constant dense<0.000000e+00> : vector<256x128xf32>
    %40 = tpu.matmul %33, %34, %cst_23 {dimension_numbers = #tpu.dot_dimension_numbers<[1], [0], [0], [1], [0, 0, 1, 1], [], []>} : vector<256x32xf32>, vector<32x128xf32>, vector<256x128xf32> -> vector<256x128xf32>
    %41 = arith.addf %40, %37 : vector<256x128xf32>
    %cst_24 = arith.constant 0.000000e+00 : f32
    %42 = vector.broadcast %cst_24 : f32 to vector<256x128xf32>
    %43 = arith.maximumf %41, %42 : vector<256x128xf32>
    %cst_25 = arith.constant dense<0.000000e+00> : vector<256x128xf32>
    %44 = tpu.matmul %43, %35, %cst_25 {dimension_numbers = #tpu.dot_dimension_numbers<[1], [0], [0], [1], [0, 0, 1, 1], [], []>} : vector<256x128xf32>, vector<128x128xf32>, vector<256x128xf32> -> vector<256x128xf32>
    %45 = vector.broadcast %38 : vector<1x128xf32> to vector<256x128xf32>
    %46 = arith.addf %44, %45 : vector<256x128xf32>
    %cst_26 = arith.constant 0.000000e+00 : f32
    %47 = vector.broadcast %cst_26 : f32 to vector<256x128xf32>
    %48 = arith.maximumf %46, %47 : vector<256x128xf32>
    %cst_27 = arith.constant dense<0.000000e+00> : vector<256x128xf32>
    %49 = tpu.matmul %48, %36, %cst_27 {dimension_numbers = #tpu.dot_dimension_numbers<[1], [0], [0], [1], [0, 0, 1, 1], [], []>} : vector<256x128xf32>, vector<128x128xf32>, vector<256x128xf32> -> vector<256x128xf32>
    %50 = vector.broadcast %39 : vector<1x128xf32> to vector<256x128xf32>
    %51 = arith.addf %49, %50 : vector<256x128xf32>
    %c0_28 = arith.constant 0 : index
    %c0_29 = arith.constant 0 : index
    %52 = vector.load %arg3[%c0_28, %c0_29] : memref<256x128xf32, #tpu.memory_space<vmem>>, vector<256x128xf32>
    tpu.vector_store %arg3[%c0_28, %c0_29], %51 {strides = array<i32>} : memref<256x128xf32, #tpu.memory_space<vmem>>, vector<256x128xf32>,
    return
  }
  func.func @transform_0(%arg0: i32) -> (i32, i32) {
    %c0_i32 = arith.constant 0 : i32
    %c0_i32_0 = arith.constant 0 : i32
    return %arg0, %c0_i32 : i32, i32
  }
  func.func @transform_1(%arg0: i32) -> (i32, i32) {
    %c0_i32 = arith.constant 0 : i32
    %c0_i32_0 = arith.constant 0 : i32
    %c0_i32_1 = arith.constant 0 : i32
    return %c0_i32, %c0_i32_0 : i32, i32
  }
  func.func @transform_2(%arg0: i32) -> (i32, i32) {
    %c0_i32 = arith.constant 0 : i32
    %c0_i32_0 = arith.constant 0 : i32
    return %arg0, %c0_i32 : i32, i32
  }
}

</mosaic_0001>

<bundles_post_ra>
// kernel: lifter_forward.1
= control target key start
LH: loop header
LB: loop body
LE: loop exit
PB: predicated region body
PF: predicated region fallthrough
CT: control target
= control target key end

     0   :  { %7 = vsyncpa [#allocation3], 0  ;;  %s4160_s9 = smov [#allocation2]   ;;  %s5511_s0 = inlined_call_operand.vmem [shape: f32[256,128], index: 0, kind: input, shape index: {}]   ;;  %s5512_s1 = inlined_call_operand.hbm [shape: f32[128,1920], index: 1, kind: input, shape index: {}]   ;;  %s5513_s2 = inlined_call_operand.vmem [shape: f32[256,128], index: 2, kind: output, shape index: {}]  }
   0x1   :  { %s15_s10 = sshll.u32 %s4160_s9, 4  ;;  %s4136_s13 = scalar_lea.hbm %s5512_s1, 30720  ;;  %s16_s10 = int_to_ptr.vmem [resolvable:$true] %s15_s10 }
   0x2   :  { %p4137_p0 = scmp.ne.s32.totalorder %s5512_s1, %s4136_s13  ;;  %p4140_p1 = scmp.lt.u32.totalorder %s4136_s13, %s5512_s1 }
   0x4   :  { %p4142_p2 = pnand %p4140_p1, %p4137_p0 }
   0x6   :  { %4145 = shalt.err (!%p4142_p2)
}
   0x7   :  { %s4146_s18 = scalar_lea.vmem %s16_s10, 30720  ;;  %p4151_p4 = scmp.lt.s32.totalorder %s16_s10, %s16_s10 }
   0x8   :  { %p4147_p3 = scmp.ne.s32.totalorder %s16_s10, %s4146_s18  ;;  %p4152_p5 = scmp.lt.s32.totalorder %s4146_s18, %s4146_s18 }
   0xa   :  { %p4153_p6 = por %p4152_p5, %p4151_p4 }
   0xc   :  { %p4154_p7 = pnand %p4153_p6, %p4147_p3 }
   0xe   :  { %4157 = shalt.err (!%p4154_p7)
}
   0xf   :  { %s4161_s19 = smov 1920   ;;  %s4162_s20 = smov 120  }
  0x10   :  { %21 = dma.hbm_to_vmem [thread:$0]  %s5512_s1, 30720, %s16_s10, [#allocation3], %s4161_s19, %s4161_s19, %s4162_s20  }
  0x11   :  { %4158 = dma.done.wait [#allocation3], 30720  }
  0x12   :  { %4159 = vsyncadd [#allocation3], 4294936576  ;;  %v4163_v0 = vmov 0.0   ;;  %v58_v1 = vld [vmem:[#allocation2 + $0x8] sm:$0xff]  ;;  %v62_v2 = vld [vmem:[#allocation2 + $0x80] sm:$0xff]  ;;  %vm676_vm0 = vcmask 261120  }
  0x13   :  { %185 = vmatprep.mubr.f32.mxu0 %v4163_v0  ;;  %329 = vmatprep.mubr.f32.mxu1 %v4163_v0  ;;  %v57_v3 = vld [vmem:[#allocation2] sm:$0xff]  ;;  %v3948_v4 = vpack.c.bf16 %v62_v2, %v58_v1  ;;  %v61_v5 = vld [vmem:[#allocation2 + $0x78] sm:$0xff]  ;;  %v70_v7 = vld [vmem:[#allocation2 + $0x170] sm:$0xff] }
  0x14   :  { %v66_v6 = vld [vmem:[#allocation2 + $0xf8] sm:$0xff]  ;;  %v3950_v8 = vpack.c.bf16 %v61_v5, %v57_v3  ;;  %v65_v10 = vld [vmem:[#allocation2 + $0xf0] sm:$0xff]  ;;  %v69_v11 = vld [vmem:[#allocation2 + $0x168] sm:$0xff] }
  0x15   :  { %v3952_v9 = vpack.c.bf16 %v70_v7, %v66_v6  ;;  %v74_v12 = vld [vmem:[#allocation2 + $0x1e8] sm:$0xff]  ;;  %3949 = vmatprep.subr.bf16.mxu0 %v3948_v4  ;;  %v78_v13 = vld [vmem:[#allocation2 + $0x260] sm:$0xff]  ;;  %4116 = vmatprep.subr.bf16.mxu1 %v3948_v4  ;;  %v3954_v14 = vpack.c.bf16 %v69_v11, %v65_v10  ;;  %v77_v17 = vld [vmem:[#allocation2 + $0x258] sm:$0xff] }
  0x16   :  { %3951 = vmatpush1.bf16.msra.mxu0 %v3950_v8  ;;  %4124 = vmatpush1.bf16.msra.mxu1 %v3950_v8  ;;  %v3956_v15 = vpack.c.bf16 %v78_v13, %v74_v12  ;;  %v73_v16 = vld [vmem:[#allocation2 + $0x1e0] sm:$0xff]  ;;  %v82_v18 = vld [vmem:[#allocation2 + $0x2d8] sm:$0xff]  ;;  %v86_v19 = vld [vmem:[#allocation2 + $0x350] sm:$0xff] }
  0x17   :  { %3953 = vmatprep.subr.bf16.mxu0 %v3952_v9  ;;  %4117 = vmatprep.subr.bf16.mxu1 %v3952_v9  ;;  %v3958_v20 = vpack.c.bf16 %v77_v17, %v73_v16  ;;  %v3960_v21 = vpack.c.bf16 %v86_v19, %v82_v18  ;;  %v81_v22 = vld [vmem:[#allocation2 + $0x2d0] sm:$0xff]  ;;  %v85_v23 = vld [vmem:[#allocation2 + $0x348] sm:$0xff]  ;;  %v94_v25 = vld [vmem:[#allocation2 + $0x440] sm:$0xff] }
  0x18   :  { %v90_v24 = vld [vmem:[#allocation2 + $0x3c8] sm:$0xff]  ;;  %v3962_v26 = vpack.c.bf16 %v85_v23, %v81_v22  ;;  %v89_v28 = vld [vmem:[#allocation2 + $0x3c0] sm:$0xff]  ;;  %v93_v29 = vld [vmem:[#allocation2 + $0x438] sm:$0xff] }
  0x19   :  { %v3964_v27 = vpack.c.bf16 %v94_v25, %v90_v24  ;;  %v98_v30 = vld [vmem:[#allocation2 + $0x4b8] sm:$0xff]  ;;  %v102_v31 = vld [vmem:[#allocation2 + $0x530] sm:$0xff]  ;;  %v3966_v32 = vpack.c.bf16 %v93_v29, %v89_v28  ;;  %v101_v35 = vld [vmem:[#allocation2 + $0x528] sm:$0xff] }
  0x1a   :  { %3955 = vmatpush1.bf16.msra.mxu0 %v3954_v14  ;;  %4125 = vmatpush1.bf16.msra.mxu1 %v3954_v14  ;;  %v3968_v33 = vpack.c.bf16 %v102_v31, %v98_v30  ;;  %v97_v34 = vld [vmem:[#allocation2 + $0x4b0] sm:$0xff]  ;;  %v106_v36 = vld [vmem:[#allocation2 + $0x5a8] sm:$0xff]  ;;  %v110_v37 = vld [vmem:[#allocation2 + $0x620] sm:$0xff] }
  0x1b   :  { %3957 = vmatprep.subr.bf16.mxu0 %v3956_v15  ;;  %4118 = vmatprep.subr.bf16.mxu1 %v3956_v15  ;;  %v3970_v38 = vpack.c.bf16 %v101_v35, %v97_v34  ;;  %v3972_v39 = vpack.c.bf16 %v110_v37, %v106_v36  ;;  %v105_v40 = vld [vmem:[#allocation2 + $0x5a0] sm:$0xff]  ;;  %v109_v41 = vld [vmem:[#allocation2 + $0x618] sm:$0xff]  ;;  %v118_v43 = vld [vmem:[#allocation2 + $0x710] sm:$0xff] }
  0x1c   :  { %v114_v42 = vld [vmem:[#allocation2 + $0x698] sm:$0xff]  ;;  %v3974_v44 = vpack.c.bf16 %v109_v41, %v105_v40  ;;  %v113_v46 = vld [vmem:[#allocation2 + $0x690] sm:$0xff]  ;;  %v117_v47 = vld [vmem:[#allocation2 + $0x708] sm:$0xff] }
  0x1d   :  { %v3976_v45 = vpack.c.bf16 %v118_v43, %v114_v42  ;;  %v667_v48 = vld [vmem:[#allocation2 + $0x20] sm:$0xff]  ;;  %v668_v49 = vld [vmem:[#allocation2 + $0x98] sm:$0xff]  ;;  %v3978_v50 = vpack.c.bf16 %v117_v47, %v113_v46  ;;  %v4209_v54 = vld [vmem:[%s5511_s0 + $0x8] sm:$0xff] }
  0x1e   :  { %3959 = vmatpush1.bf16.msra.mxu0 %v3958_v20  ;;  %4126 = vmatpush1.bf16.msra.mxu1 %v3958_v20  ;;  %v4012_v51 = vpack.c.bf16 %v668_v49, %v667_v48  ;;  %v4196_v52 = vld [vmem:[%s5511_s0] sm:$0xff]  ;;  %v4215_v55 = vld [vmem:[%s5511_s0 + $0xc8] sm:$0xff]  ;;  %v4223_v56 = vld [vmem:[%s5511_s0 + $0x10] sm:$0xff] }
  0x1f   :  { %3961 = vmatprep.subr.bf16.mxu0 %v3960_v21  ;;  %4119 = vmatprep.subr.bf16.mxu1 %v3960_v21  ;;  %v4201_v53 = vld [vmem:[%s5511_s0 + $0xc0] sm:$0xff]  ;;  %v4229_v57 = vld [vmem:[%s5511_s0 + $0xd0] sm:$0xff]  ;;  %v4237_v58 = vld [vmem:[%s5511_s0 + $0x18] sm:$0xff] }
  0x20   :  { %v4243_v59 = vld [vmem:[%s5511_s0 + $0xd8] sm:$0xff]  ;;  %v4251_v60 = vld [vmem:[%s5511_s0 + $0x20] sm:$0xff]  ;;  %v4265_v62 = vld [vmem:[%s5511_s0 + $0x28] sm:$0xff] }
  0x21   :  { %v4257_v61 = vld [vmem:[%s5511_s0 + $0xe0] sm:$0xff]  ;;  %v4271_v63 = vld [vmem:[%s5511_s0 + $0xe8] sm:$0xff]  ;;  %v4279_v1 = vld [vmem:[%s5511_s0 + $0x30] sm:$0xff] }
  0x22   :  { %3963 = vmatpush1.bf16.msra.mxu0 %v3962_v26  ;;  %4127 = vmatpush1.bf16.msra.mxu1 %v3962_v26  ;;  %v4285_v2 = vld [vmem:[%s5511_s0 + $0xf0] sm:$0xff]  ;;  %v4293_v3 = vld [vmem:[%s5511_s0 + $0x38] sm:$0xff]  ;;  %v4307_v5 = vld [vmem:[%s5511_s0 + $0x40] sm:$0xff] }
  0x23   :  { %3965 = vmatprep.subr.bf16.mxu0 %v3964_v27  ;;  %4120 = vmatprep.subr.bf16.mxu1 %v3964_v27  ;;  %v4299_v4 = vld [vmem:[%s5511_s0 + $0xf8] sm:$0xff]  ;;  %v4315_v6 = vld [vmem:[%s5511_s0 + $0x48] sm:$0xff]  ;;  %v4322_v7 = vld [vmem:[%s5511_s0 + $0x50] sm:$0xff] }
  0x24   :  { %v4329_v8 = vld [vmem:[%s5511_s0 + $0x58] sm:$0xff]  ;;  %v4336_v9 = vld [vmem:[%s5511_s0 + $0x60] sm:$0xff]  ;;  %v4343_v10 = vld [vmem:[%s5511_s0 + $0x68] sm:$0xff] }
  0x25   :  { %v4350_v11 = vld [vmem:[%s5511_s0 + $0x70] sm:$0xff]  ;;  %v4357_v12 = vld [vmem:[%s5511_s0 + $0x78] sm:$0xff]  ;;  %v4364_v13 = vld [vmem:[%s5511_s0 + $0x80] sm:$0xff] }
  0x26   :  { %3967 = vmatpush1.bf16.msra.mxu0 %v3966_v32  ;;  %4128 = vmatpush1.bf16.msra.mxu1 %v3966_v32  ;;  %v4371_v14 = vld [vmem:[%s5511_s0 + $0x88] sm:$0xff]  ;;  %v4378_v15 = vld [vmem:[%s5511_s0 + $0x90] sm:$0xff]  ;;  %v4385_v16 = vld [vmem:[%s5511_s0 + $0x98] sm:$0xff] }
  0x27   :  { %3969 = vmatprep.subr.bf16.mxu0 %v3968_v33  ;;  %4121 = vmatprep.subr.bf16.mxu1 %v3968_v33  ;;  %v4392_v17 = vld [vmem:[%s5511_s0 + $0xa0] sm:$0xff]  ;;  %v4399_v18 = vld [vmem:[%s5511_s0 + $0xa8] sm:$0xff]  ;;  %v669_v19 = vld [vmem:[#allocation2 + $0x110] sm:$0xff] }
  0x28   :  { %v670_v20 = vld [vmem:[#allocation2 + $0x188] sm:$0xff]  ;;  %v4406_v22 = vld [vmem:[%s5511_s0 + $0xb0] sm:$0xff]  ;;  %v4413_v23 = vld [vmem:[%s5511_s0 + $0xb8] sm:$0xff] }
  0x29   :  { %v4016_v21 = vpack.c.bf16 %v670_v20, %v669_v19  ;;  %v60_v24 = vld [vmem:[#allocation2 + $0x18] sm:$0xff]  ;;  %v64_v25 = vld [vmem:[#allocation2 + $0x90] sm:$0xff]  ;;  %v63_v28 = vld [vmem:[#allocation2 + $0x88] sm:$0xff] }
  0x2a   :  { %3971 = vmatpush1.bf16.msra.mxu0 %v3970_v38  ;;  %4129 = vmatpush1.bf16.msra.mxu1 %v3970_v38  ;;  %v3980_v26 = vpack.c.bf16 %v64_v25, %v60_v24  ;;  %v59_v27 = vld [vmem:[#allocation2 + $0x10] sm:$0xff]  ;;  %v68_v30 = vld [vmem:[#allocation2 + $0x108] sm:$0xff]  ;;  %v72_v31 = vld [vmem:[#allocation2 + $0x180] sm:$0xff] }
  0x2b   :  { %3973 = vmatprep.subr.bf16.mxu0 %v3972_v39  ;;  %4122 = vmatprep.subr.bf16.mxu1 %v3972_v39  ;;  %v3982_v29 = vpack.c.bf16 %v63_v28, %v59_v27  ;;  %v3984_v32 = vpack.c.bf16 %v72_v31, %v68_v30  ;;  %v67_v33 = vld [vmem:[#allocation2 + $0x100] sm:$0xff]  ;;  %v71_v34 = vld [vmem:[#allocation2 + $0x178] sm:$0xff]  ;;  %v80_v37 = vld [vmem:[#allocation2 + $0x270] sm:$0xff] }
  0x2c   :  { %v3986_v35 = vpack.c.bf16 %v71_v34, %v67_v33  ;;  %v76_v36 = vld [vmem:[#allocation2 + $0x1f8] sm:$0xff]  ;;  %v75_v39 = vld [vmem:[#allocation2 + $0x1f0] sm:$0xff]  ;;  %v79_v40 = vld [vmem:[#allocation2 + $0x268] sm:$0xff] }
  0x2d   :  { %v3988_v38 = vpack.c.bf16 %v80_v37, %v76_v36  ;;  %v3990_v41 = vpack.c.bf16 %v79_v40, %v75_v39  ;;  %v84_v42 = vld [vmem:[#allocation2 + $0x2e8] sm:$0xff]  ;;  %v88_v43 = vld [vmem:[#allocation2 + $0x360] sm:$0xff]  ;;  %v87_v46 = vld [vmem:[#allocation2 + $0x358] sm:$0xff] }
  0x2e   :  { %3975 = vmatpush1.bf16.msra.mxu0 %v3974_v44  ;;  %4130 = vmatpush1.bf16.msra.mxu1 %v3974_v44  ;;  %v3992_v44 = vpack.c.bf16 %v88_v43, %v84_v42  ;;  %v92_v48 = vld [vmem:[#allocation2 + $0x3d8] sm:$0xff]  ;;  %v96_v49 = vld [vmem:[#allocation2 + $0x450] sm:$0xff]  ;;  %v95_v19 = vld [vmem:[#allocation2 + $0x448] sm:$0xff] }
  0x2f   :  { %3977 = vmatprep.subr.bf16.mxu0 %v3976_v45  ;;  %4123 = vmatprep.subr.bf16.mxu1 %v3976_v45  ;;  %v83_v45 = vld [vmem:[#allocation2 + $0x2e0] sm:$0xff]  ;;  %v103_v27 = vld [vmem:[#allocation2 + $0x538] sm:$0xff]  ;;  %v112_v30 = vld [vmem:[#allocation2 + $0x630] sm:$0xff] }
  0x30   :  { %v3994_v47 = vpack.c.bf16 %v87_v46, %v83_v45  ;;  %v104_v24 = vld [vmem:[#allocation2 + $0x540] sm:$0xff]  ;;  %v111_v33 = vld [vmem:[#allocation2 + $0x628] sm:$0xff]  ;;  %v119_v39 = vld [vmem:[#allocation2 + $0x718] sm:$0xff] }
  0x31   :  { %v120_v36 = vld [vmem:[#allocation2 + $0x720] sm:$0xff]  ;;  %v673_v43 = vld [vmem:[#allocation2 + $0x118] sm:$0xff]  ;;  %v674_v45 = vld [vmem:[#allocation2 + $0x190] sm:$0xff] }
  0x32   :  { %3979 = vmatpush1.bf16.msra.mxu0 %v3978_v50  ;;  %4131 = vmatpush1.bf16.msra.mxu1 %v3978_v50  ;;  %v3996_v50 = vpack.c.bf16 %v96_v49, %v92_v48  ;;  %v672_v42 = vld [vmem:[#allocation2 + $0xa0] sm:$0xff] }
  0x33   :  { %4013 = vmatprep.subr.bf16.mxu0 %v4012_v51  ;;  %3981 = vmatprep.subr.bf16.mxu1 %v3980_v26  ;;  %v99_v26 = vld [vmem:[#allocation2 + $0x4c0] sm:$0xff] }
  0x34   :  { %v4002_v28 = vpack.c.bf16 %v103_v27, %v99_v26 }
  0x35   :  { %186 = vmatmul.mubr.f32.vlgmr.msra.gmra.mrb[0].mxu0 %v4196_v52  ;;  %330 = vmatmul.mubr.f32.vlgmr.msra.gmra.mrb[0].mxu1 %v4201_v53 }
  0x36   :  { %191 = vmatprep.mubr.f32.mxu0 %v4163_v0  ;;  %335 = vmatprep.mubr.f32.mxu1 %v4163_v0 }
  0x37   :  { %4015 = vmatpush3.bf16.msra.mxu0 %v4012_v51  ;;  %3983 = vmatpush1.bf16.msra.mxu1 %v3982_v29  ;;  %v91_v51 = vld [vmem:[#allocation2 + $0x3d0] sm:$0xff]  ;;  %v108_v29 = vld [vmem:[#allocation2 + $0x5b8] sm:$0xff] }
  0x38   :  { %4017 = vmatprep.subr.bf16.mxu0 %v4016_v21  ;;  %3985 = vmatprep.subr.bf16.mxu1 %v3984_v32  ;;  %v3998_v20 = vpack.c.bf16 %v95_v19, %v91_v51  ;;  %v4004_v31 = vpack.c.bf16 %v112_v30, %v108_v29  ;;  %v107_v32 = vld [vmem:[#allocation2 + $0x5b0] sm:$0xff] }
  0x39   :  { %192 = vmatmul.mubr.f32.gmra.mrb[2].mxu0 %v4209_v54  ;;  %336 = vmatmul.mubr.f32.gmra.mrb[2].mxu1 %v4215_v55  ;;  %v4006_v34 = vpack.c.bf16 %v111_v33, %v107_v32 }
  0x3a   :  { %197 = vmatprep.mubr.f32.mxu0 %v4163_v0  ;;  %341 = vmatprep.mubr.f32.mxu1 %v4163_v0 }
  0x3b   :  { %4019 = vmatpush3.bf16.msra.mxu0 %v4016_v21  ;;  %3987 = vmatpush1.bf16.msra.mxu1 %v3986_v35  ;;  %v100_v21 = vld [vmem:[#allocation2 + $0x4c8] sm:$0xff] }
  0x3c   :  { %3989 = vmatprep.subr.bf16.mxu1 %v3988_v38  ;;  %v4000_v25 = vpack.c.bf16 %v104_v24, %v100_v21  ;;  %v116_v35 = vld [vmem:[#allocation2 + $0x6a8] sm:$0xff]  ;;  %v115_v38 = vld [vmem:[#allocation2 + $0x6a0] sm:$0xff] }
  0x3d   :  { %198 = vmatmul.mubr.f32.gmra.mrb[4].mxu0 %v4223_v56  ;;  %342 = vmatmul.mubr.f32.gmra.mrb[4].mxu1 %v4229_v57  ;;  %v4008_v37 = vpack.c.bf16 %v120_v36, %v116_v35  ;;  %v4010_v40 = vpack.c.bf16 %v119_v39, %v115_v38 }
  0x3e   :  { %203 = vmatprep.mubr.f32.mxu0 %v4163_v0  ;;  %347 = vmatprep.mubr.f32.mxu1 %v4163_v0 }
  0x3f   :  { %3991 = vmatpush1.bf16.msra.mxu1 %v3990_v41  ;;  %v671_v41 = vld [vmem:[#allocation2 + $0x28] sm:$0xff] }
  0x40   :  { %3993 = vmatprep.subr.bf16.mxu1 %v3992_v44  ;;  %v4020_v44 = vpack.c.bf16 %v672_v42, %v671_v41 }
  0x41   :  { %204 = vmatmul.mubr.f32.gmra.mrb[6].mxu0 %v4237_v58  ;;  %348 = vmatmul.mubr.f32.gmra.mrb[6].mxu1 %v4243_v59 }
  0x42   :  { %209 = vmatprep.mubr.f32.mxu0 %v4163_v0  ;;  %353 = vmatprep.mubr.f32.mxu1 %v4163_v0 }
  0x43   :  { %3995 = vmatpush1.bf16.msra.mxu1 %v3994_v47 }
  0x44   :  { %3997 = vmatprep.subr.bf16.mxu1 %v3996_v50 }
  0x45   :  { %210 = vmatmul.mubr.f32.gmra.mrb[8].mxu0 %v4251_v60  ;;  %354 = vmatmul.mubr.f32.gmra.mrb[8].mxu1 %v4257_v61 }
  0x46   :  { %215 = vmatprep.mubr.f32.mxu0 %v4163_v0  ;;  %359 = vmatprep.mubr.f32.mxu1 %v4163_v0 }
  0x47   :  { %3999 = vmatpush1.bf16.msra.mxu1 %v3998_v20 }
  0x48   :  { %4001 = vmatprep.subr.bf16.mxu1 %v4000_v25 }
  0x49   :  { %216 = vmatmul.mubr.f32.gmra.mrb[10].mxu0 %v4265_v62  ;;  %360 = vmatmul.mubr.f32.gmra.mrb[10].mxu1 %v4271_v63 }
  0x4a   :  { %221 = vmatprep.mubr.f32.mxu0 %v4163_v0  ;;  %365 = vmatprep.mubr.f32.mxu1 %v4163_v0 }
  0x4b   :  { %4003 = vmatpush1.bf16.msra.mxu1 %v4002_v28 }
  0x4c   :  { %4005 = vmatprep.subr.bf16.mxu1 %v4004_v31 }
  0x4d   :  { %222 = vmatmul.mubr.f32.gmra.mrb[12].mxu0 %v4279_v1  ;;  %366 = vmatmul.mubr.f32.gmra.mrb[12].mxu1 %v4285_v2 }
  0x4e   :  { %227 = vmatprep.mubr.f32.mxu0 %v4163_v0  ;;  %371 = vmatprep.mubr.f32.mxu1 %v4163_v0 }
  0x4f   :  { %4007 = vmatpush1.bf16.msra.mxu1 %v4006_v34 }
  0x50   :  { %4009 = vmatprep.subr.bf16.mxu1 %v4008_v37 }
  0x51   :  { %228 = vmatmul.mubr.f32.gmra.mrb[14].mxu0 %v4293_v3  ;;  %372 = vmatmul.mubr.f32.gmra.mrb[14].mxu1 %v4299_v4 }
  0x52   :  { %233 = vmatprep.mubr.f32.mxu0 %v4163_v0  ;;  %442 = vmatprep.mubr.f32.mxu1 %v4163_v0 }
  0x53   :  { %4011 = vmatpush1.bf16.msra.mxu1 %v4010_v40 }
  0x54   :  { %4021 = vmatprep.subr.bf16.mxu1 %v4020_v44 }
  0x55   :  { %234 = vmatmul.mubr.f32.gmra.mrb[16].mxu0 %v4307_v5 }
  0x56   :  { %239 = vmatprep.mubr.f32.mxu0 %v4163_v0  ;;  %443 = vmatmul.mubr.f32.vlgmr.msra.gmra.mrb[16].mxu1 %v4196_v52  ;;  %v4024_v52 = vpack.c.bf16 %v674_v45, %v673_v43 }
  0x57   :  { %448 = vmatprep.mubr.f32.mxu1 %v4163_v0  ;;  %4023 = vmatpush3.bf16.msra.mxu1 %v4020_v44 }
  0x58   :  { %4025 = vmatprep.subr.bf16.mxu1 %v4024_v52 }
  0x59   :  { %240 = vmatmul.mubr.f32.gmra.mrb[18].mxu0 %v4315_v6 }
  0x5a   :  { %245 = vmatprep.mubr.f32.mxu0 %v4163_v0  ;;  %449 = vmatmul.mubr.f32.gmra.mrb[18].mxu1 %v4209_v54 }
  0x5b   :  { %454 = vmatprep.mubr.f32.mxu1 %v4163_v0  ;;  %4027 = vmatpush3.bf16.msra.mxu1 %v4024_v52 }
  0x5d   :  { %246 = vmatmul.mubr.f32.gmra.mrb[20].mxu0 %v4322_v7 }
  0x5e   :  { %251 = vmatprep.mubr.f32.mxu0 %v4163_v0  ;;  %455 = vmatmul.mubr.f32.gmra.mrb[20].mxu1 %v4223_v56 }
  0x5f   :  { %460 = vmatprep.mubr.f32.mxu1 %v4163_v0 }
  0x61   :  { %252 = vmatmul.mubr.f32.gmra.mrb[22].mxu0 %v4329_v8 }
  0x62   :  { %257 = vmatprep.mubr.f32.mxu0 %v4163_v0  ;;  %461 = vmatmul.mubr.f32.gmra.mrb[22].mxu1 %v4237_v58 }
  0x63   :  { %466 = vmatprep.mubr.f32.mxu1 %v4163_v0 }
  0x65   :  { %258 = vmatmul.mubr.f32.gmra.mrb[24].mxu0 %v4336_v9 }
  0x66   :  { %263 = vmatprep.mubr.f32.mxu0 %v4163_v0  ;;  %467 = vmatmul.mubr.f32.gmra.mrb[24].mxu1 %v4251_v60 }
  0x67   :  { %472 = vmatprep.mubr.f32.mxu1 %v4163_v0 }
  0x69   :  { %264 = vmatmul.mubr.f32.gmra.mrb[26].mxu0 %v4343_v10 }
  0x6a   :  { %269 = vmatprep.mubr.f32.mxu0 %v4163_v0  ;;  %473 = vmatmul.mubr.f32.gmra.mrb[26].mxu1 %v4265_v62 }
  0x6b   :  { %478 = vmatprep.mubr.f32.mxu1 %v4163_v0 }
  0x6d   :  { %270 = vmatmul.mubr.f32.gmra.mrb[28].mxu0 %v4350_v11 }
  0x6e   :  { %275 = vmatprep.mubr.f32.mxu0 %v4163_v0  ;;  %479 = vmatmul.mubr.f32.gmra.mrb[28].mxu1 %v4279_v1 }
  0x6f   :  { %484 = vmatprep.mubr.f32.mxu1 %v4163_v0 }
  0x71   :  { %276 = vmatmul.mubr.f32.gmra.mrb[30].mxu0 %v4357_v12 }
  0x72   :  { %281 = vmatprep.mubr.f32.mxu0 %v4163_v0  ;;  %485 = vmatmul.mubr.f32.gmra.mrb[30].mxu1 %v4293_v3 }
  0x73   :  { %490 = vmatprep.mubr.f32.mxu1 %v4163_v0 }
  0x75   :  { %282 = vmatmul.mubr.f32.gmra.mrb[32].mxu0 %v4364_v13 }
  0x76   :  { %287 = vmatprep.mubr.f32.mxu0 %v4163_v0  ;;  %491 = vmatmul.mubr.f32.gmra.mrb[32].mxu1 %v4307_v5 }
  0x77   :  { %496 = vmatprep.mubr.f32.mxu1 %v4163_v0 }
  0x79   :  { %288 = vmatmul.mubr.f32.gmra.mrb[34].mxu0 %v4371_v14 }
  0x7a   :  { %293 = vmatprep.mubr.f32.mxu0 %v4163_v0  ;;  %497 = vmatmul.mubr.f32.gmra.mrb[34].mxu1 %v4315_v6 }
  0x7b   :  { %502 = vmatprep.mubr.f32.mxu1 %v4163_v0 }
  0x7d   :  { %294 = vmatmul.mubr.f32.gmra.mrb[36].mxu0 %v4378_v15 }
  0x7e   :  { %299 = vmatprep.mubr.f32.mxu0 %v4163_v0  ;;  %503 = vmatmul.mubr.f32.gmra.mrb[36].mxu1 %v4322_v7 }
  0x7f   :  { %508 = vmatprep.mubr.f32.mxu1 %v4163_v0 }
  0x81   :  { %300 = vmatmul.mubr.f32.gmra.mrb[38].mxu0 %v4385_v16 }
  0x82   :  { %305 = vmatprep.mubr.f32.mxu0 %v4163_v0  ;;  %509 = vmatmul.mubr.f32.gmra.mrb[38].mxu1 %v4329_v8 }
  0x83   :  { %514 = vmatprep.mubr.f32.mxu1 %v4163_v0 }
  0x85   :  { %306 = vmatmul.mubr.f32.gmra.mrb[40].mxu0 %v4392_v17 }
  0x86   :  { %311 = vmatprep.mubr.f32.mxu0 %v4163_v0  ;;  %515 = vmatmul.mubr.f32.gmra.mrb[40].mxu1 %v4336_v9 }
  0x87   :  { %520 = vmatprep.mubr.f32.mxu1 %v4163_v0 }
  0x89   :  { %312 = vmatmul.mubr.f32.gmra.mrb[42].mxu0 %v4399_v18 }
  0x8a   :  { %317 = vmatprep.mubr.f32.mxu0 %v4163_v0  ;;  %521 = vmatmul.mubr.f32.gmra.mrb[42].mxu1 %v4343_v10 }
  0x8b   :  { %526 = vmatprep.mubr.f32.mxu1 %v4163_v0 }
  0x8d   :  { %318 = vmatmul.mubr.f32.gmra.mrb[44].mxu0 %v4406_v22 }
  0x8e   :  { %323 = vmatprep.mubr.f32.mxu0 %v4163_v0  ;;  %527 = vmatmul.mubr.f32.gmra.mrb[44].mxu1 %v4350_v11 }
  0x8f   :  { %532 = vmatprep.mubr.f32.mxu1 %v4163_v0 }
  0x91   :  { %324 = vmatmul.mubr.f32.gmra.mrb[46].mxu0 %v4413_v23 }
  0x92   :  { %533 = vmatmul.mubr.f32.gmra.mrb[46].mxu1 %v4357_v12 }
  0x93   :  { %538 = vmatprep.mubr.f32.mxu1 %v4163_v0 }
  0x96   :  { %539 = vmatmul.mubr.f32.gmra.mrb[48].mxu1 %v4364_v13 }
  0x97   :  { %544 = vmatprep.mubr.f32.mxu1 %v4163_v0 }
  0x9a   :  { %545 = vmatmul.mubr.f32.gmra.mrb[50].mxu1 %v4371_v14 }
  0x9b   :  { %550 = vmatprep.mubr.f32.mxu1 %v4163_v0 }
  0x9e   :  { %551 = vmatmul.mubr.f32.gmra.mrb[52].mxu1 %v4378_v15 }
  0x9f   :  { %556 = vmatprep.mubr.f32.mxu1 %v4163_v0 }
  0xa2   :  { %557 = vmatmul.mubr.f32.gmra.mrb[54].mxu1 %v4385_v16 }
  0xa3   :  { %562 = vmatprep.mubr.f32.mxu1 %v4163_v0 }
  0xa6   :  { %563 = vmatmul.mubr.f32.gmra.mrb[56].mxu1 %v4392_v17 }
  0xa7   :  { %568 = vmatprep.mubr.f32.mxu1 %v4163_v0 }
  0xaa   :  { %569 = vmatmul.mubr.f32.gmra.mrb[58].mxu1 %v4399_v18 }
  0xab   :  { %574 = vmatprep.mubr.f32.mxu1 %v4163_v0 }
  0xae   :  { %575 = vmatmul.mubr.f32.gmra.mrb[60].mxu1 %v4406_v22 }
  0xaf   :  { %580 = vmatprep.mubr.f32.mxu1 %v4163_v0 }
  0xb2   :  { %581 = vmatmul.mubr.f32.gmra.mrb[62].mxu1 %v4413_v23 }
  0xb3   :  { %586 = vmatprep.mubr.f32.mxu1 %v4163_v0 }
  0xb6   :  { %587 = vmatmul.mubr.f32.gmra.mrb[64].mxu1 %v4201_v53 }
  0xb7   :  { %592 = vmatprep.mubr.f32.mxu1 %v4163_v0 }
  0xba   :  { %593 = vmatmul.mubr.f32.gmra.mrb[66].mxu1 %v4215_v55 }
  0xbb   :  { %598 = vmatprep.mubr.f32.mxu1 %v4163_v0 }
  0xbe   :  { %599 = vmatmul.mubr.f32.gmra.mrb[68].mxu1 %v4229_v57 }
  0xbf   :  { %604 = vmatprep.mubr.f32.mxu1 %v4163_v0 }
  0xc2   :  { %605 = vmatmul.mubr.f32.gmra.mrb[70].mxu1 %v4243_v59 }
  0xc3   :  { %610 = vmatprep.mubr.f32.mxu1 %v4163_v0 }
  0xc6   :  { %611 = vmatmul.mubr.f32.gmra.mrb[72].mxu1 %v4257_v61 }
  0xc7   :  { %616 = vmatprep.mubr.f32.mxu1 %v4163_v0 }
  0xca   :  { %617 = vmatmul.mubr.f32.gmra.mrb[74].mxu1 %v4271_v63 }
  0xcb   :  { %622 = vmatprep.mubr.f32.mxu1 %v4163_v0 }
  0xce   :  { %623 = vmatmul.mubr.f32.gmra.mrb[76].mxu1 %v4285_v2 }
  0xcf   :  { %628 = vmatprep.mubr.f32.mxu1 %v4163_v0 }
  0xd2   :  { %629 = vmatmul.mubr.f32.gmra.mrb[78].mxu1 %v4299_v4 }
 0x108   :  { %v4432_v54 = vpop.f32.mrb[0].mxu0  ;;  %v4434_v56 = vpop.f32.mrb[0].mxu1 }
 0x109   :  { %v5528_v58 = vmax.f32 %v4432_v54, 0.0  ;;  %v4437_v60 = vpop.f32.mrb[1].mxu0  ;;  %v4439_v62 = vpop.f32.mrb[1].mxu1 }
 0x10b   :  { %3516 = vmatprep.mubr.msk.f32.mxu0 %vm676_vm0, %v5528_v58 }
 0x10c   :  { %v4446_v1 = vpop.f32.mrb[2].mxu0  ;;  %v4448_v3 = vpop.f32.mrb[2].mxu1 }
 0x10d   :  { %v5526_v46 = vmax.f32 %v4446_v1, 0.0  ;;  %v4451_v47 = vpop.f32.mrb[3].mxu0  ;;  %v4453_v48 = vpop.f32.mrb[3].mxu1  ;;  %v5544_v0 = vmax.f32 %v4448_v3, 0.0 }
 0x10f   :  { %3517 = vmatmul.mubr.msk.f32.vlgmr.msra.gmra.mrb[48].mxu0 %vm676_vm0, %v5526_v46 }
 0x110   :  { %v4460_v5 = vpop.f32.mrb[4].mxu0  ;;  %v4462_v49 = vpop.f32.mrb[4].mxu1 }
 0x111   :  { %5561 = vst [vmem:[#allocation5_spill] sm:$0xff] %v4462_v49  ;;  %v5524_v50 = vmax.f32 %v4460_v5, 0.0  ;;  %v4465_v51 = vpop.f32.mrb[5].mxu0  ;;  %v4467_v19 = vpop.f32.mrb[5].mxu1  ;;  %v5547_v2 = vmax.f32 %v4462_v49, 0.0 }
 0x113   :  { %3519 = vmatprep.mubr.msk.f32.mxu0 %vm676_vm0, %v5524_v50 }
 0x114   :  { %v4474_v6 = vpop.f32.mrb[6].mxu0  ;;  %v4476_v20 = vpop.f32.mrb[6].mxu1 }
 0x115   :  { %5562 = vst [vmem:[#allocation6_spill] sm:$0xff] %v4476_v20  ;;  %v5522_v21 = vmax.f32 %v4474_v6, 0.0  ;;  %v4479_v24 = vpop.f32.mrb[7].mxu0  ;;  %v4481_v25 = vpop.f32.mrb[7].mxu1  ;;  %v5546_v4 = vmax.f32 %v4476_v20, 0.0 }
 0x117   :  { %3520 = vmatmul.mubr.msk.f32.gmra.mrb[50].mxu0 %vm676_vm0, %v5522_v21 }
 0x118   :  { %v4488_v7 = vpop.f32.mrb[8].mxu0  ;;  %v4490_v26 = vpop.f32.mrb[8].mxu1 }
 0x119   :  { %5563 = vst [vmem:[#allocation7_spill] sm:$0xff] %v4490_v26  ;;  %v5520_v27 = vmax.f32 %v4488_v7, 0.0  ;;  %v4493_v28 = vpop.f32.mrb[9].mxu0  ;;  %v4495_v29 = vpop.f32.mrb[9].mxu1 }
 0x11b   :  { %3522 = vmatprep.mubr.msk.f32.mxu0 %vm676_vm0, %v5520_v27 }
 0x11c   :  { %v4502_v8 = vpop.f32.mrb[10].mxu0  ;;  %v4504_v30 = vpop.f32.mrb[10].mxu1 }
 0x11d   :  { %5564 = vst [vmem:[#allocation8_spill] sm:$0xff] %v4504_v30  ;;  %v5518_v31 = vmax.f32 %v4502_v8, 0.0  ;;  %v4507_v32 = vpop.f32.mrb[11].mxu0  ;;  %v4509_v33 = vpop.f32.mrb[11].mxu1 }
 0x11f   :  { %3523 = vmatmul.mubr.msk.f32.gmra.mrb[52].mxu0 %vm676_vm0, %v5518_v31 }
 0x120   :  { %v4516_v9 = vpop.f32.mrb[12].mxu0  ;;  %v4518_v34 = vpop.f32.mrb[12].mxu1 }
 0x121   :  { %5565 = vst [vmem:[#allocation9_spill] sm:$0xff] %v4518_v34  ;;  %v5516_v35 = vmax.f32 %v4516_v9, 0.0  ;;  %v4521_v36 = vpop.f32.mrb[13].mxu0  ;;  %v4523_v37 = vpop.f32.mrb[13].mxu1 }
 0x123   :  { %3525 = vmatprep.mubr.msk.f32.mxu0 %vm676_vm0, %v5516_v35 }
 0x124   :  { %v4530_v10 = vpop.f32.mrb[14].mxu0  ;;  %v4532_v38 = vpop.f32.mrb[14].mxu1 }
 0x125   :  { %5566 = vst [vmem:[#allocation10_spill] sm:$0xff] %v4532_v38  ;;  %v5514_v39 = vmax.f32 %v4530_v10, 0.0  ;;  %v4535_v40 = vpop.f32.mrb[15].mxu0  ;;  %v4537_v41 = vpop.f32.mrb[15].mxu1 }
 0x127   :  { %3526 = vmatmul.mubr.msk.f32.gmra.mrb[54].mxu0 %vm676_vm0, %v5514_v39 }
 0x128   :  { %v4544_v11 = vpop.f32.mrb[16].mxu0 }
 0x129   :  { %v5515_v42 = vmax.f32 %v4544_v11, 0.0  ;;  %v4547_v43 = vpop.f32.mrb[17].mxu0 }
 0x12b   :  { %3528 = vmatprep.mubr.msk.f32.mxu0 %vm676_vm0, %v5515_v42 }
 0x12c   :  { %v4554_v12 = vpop.f32.mrb[18].mxu0 }
 0x12d   :  { %v5517_v44 = vmax.f32 %v4554_v12, 0.0  ;;  %v4557_v45 = vpop.f32.mrb[19].mxu0 }
 0x12f   :  { %3529 = vmatmul.mubr.msk.f32.gmra.mrb[56].mxu0 %vm676_vm0, %v5517_v44 }
 0x130   :  { %v4564_v13 = vpop.f32.mrb[20].mxu0 }
 0x131   :  { %v5519_v52 = vmax.f32 %v4564_v13, 0.0  ;;  %v4567_v39 = vpop.f32.mrb[21].mxu0 }
 0x133   :  { %3531 = vmatprep.mubr.msk.f32.mxu0 %vm676_vm0, %v5519_v52 }
 0x134   :  { %v4574_v14 = vpop.f32.mrb[22].mxu0 }
 0x135   :  { %v5521_v42 = vmax.f32 %v4574_v14, 0.0  ;;  %v4577_v35 = vpop.f32.mrb[23].mxu0 }
 0x137   :  { %3532 = vmatmul.mubr.msk.f32.gmra.mrb[58].mxu0 %vm676_vm0, %v5521_v42 }
 0x138   :  { %v4584_v15 = vpop.f32.mrb[24].mxu0 }
 0x139   :  { %v5523_v44 = vmax.f32 %v4584_v15, 0.0  ;;  %v4587_v31 = vpop.f32.mrb[25].mxu0 }
 0x13b   :  { %3534 = vmatprep.mubr.msk.f32.mxu0 %vm676_vm0, %v5523_v44 }
 0x13c   :  { %v4594_v16 = vpop.f32.mrb[26].mxu0 }
 0x13d   :  { %v5525_v52 = vmax.f32 %v4594_v16, 0.0  ;;  %v4597_v27 = vpop.f32.mrb[27].mxu0 }
 0x13f   :  { %3535 = vmatmul.mubr.msk.f32.gmra.mrb[60].mxu0 %vm676_vm0, %v5525_v52 }
 0x140   :  { %v4604_v17 = vpop.f32.mrb[28].mxu0 }
 0x141   :  { %v5527_v42 = vmax.f32 %v4604_v17, 0.0  ;;  %v4607_v21 = vpop.f32.mrb[29].mxu0 }
 0x143   :  { %3537 = vmatprep.mubr.msk.f32.mxu0 %vm676_vm0, %v5527_v42 }
 0x144   :  { %v4614_v18 = vpop.f32.mrb[30].mxu0 }
 0x145   :  { %v5529_v44 = vmax.f32 %v4614_v18, 0.0  ;;  %v4617_v50 = vpop.f32.mrb[31].mxu0 }
 0x147   :  { %3538 = vmatmul.mubr.msk.f32.gmra.mrb[62].mxu0 %vm676_vm0, %v5529_v44 }
 0x148   :  { %v4624_v22 = vpop.f32.mrb[32].mxu0 }
 0x149   :  { %5567 = vst [vmem:[#allocation11_spill] sm:$0xff] %v4624_v22  ;;  %v5531_v52 = vmax.f32 %v4624_v22, 0.0  ;;  %v4627_v46 = vpop.f32.mrb[33].mxu0 }
 0x14b   :  { %3540 = vmatprep.mubr.msk.f32.mxu0 %vm676_vm0, %v5531_v52 }
 0x14c   :  { %v4634_v23 = vpop.f32.mrb[34].mxu0 }
 0x14d   :  { %5568 = vst [vmem:[#allocation12_spill] sm:$0xff] %v4634_v23  ;;  %v5533_v42 = vmax.f32 %v4634_v23, 0.0  ;;  %v4637_v58 = vpop.f32.mrb[35].mxu0 }
 0x14f   :  { %3541 = vmatmul.mubr.msk.f32.gmra.mrb[64].mxu0 %vm676_vm0, %v5533_v42 }
 0x150   :  { %v4644_v53 = vpop.f32.mrb[36].mxu0 }
 0x151   :  { %5569 = vst [vmem:[#allocation13_spill] sm:$0xff] %v4644_v53  ;;  %v5535_v44 = vmax.f32 %v4644_v53, 0.0  ;;  %v4647_v22 = vpop.f32.mrb[37].mxu0 }
 0x153   :  { %3543 = vmatprep.mubr.msk.f32.mxu0 %vm676_vm0, %v5535_v44 }
 0x154   :  { %v4654_v55 = vpop.f32.mrb[38].mxu0 }
 0x155   :  { %5570 = vst [vmem:[#allocation14_spill] sm:$0xff] %v4654_v55  ;;  %v5537_v52 = vmax.f32 %v4654_v55, 0.0  ;;  %v4657_v23 = vpop.f32.mrb[39].mxu0 }
 0x157   :  { %3544 = vmatmul.mubr.msk.f32.gmra.mrb[66].mxu0 %vm676_vm0, %v5537_v52 }
 0x158   :  { %v4664_v57 = vpop.f32.mrb[40].mxu0 }
 0x159   :  { %5571 = vst [vmem:[#allocation15_spill] sm:$0xff] %v4664_v57  ;;  %v5539_v42 = vmax.f32 %v4664_v57, 0.0  ;;  %v4667_v53 = vpop.f32.mrb[41].mxu0 }
 0x15b   :  { %3546 = vmatprep.mubr.msk.f32.mxu0 %vm676_vm0, %v5539_v42 }
 0x15c   :  { %v4674_v59 = vpop.f32.mrb[42].mxu0 }
 0x15d   :  { %5572 = vst [vmem:[#allocation16_spill] sm:$0xff] %v4674_v59  ;;  %v5541_v44 = vmax.f32 %v4674_v59, 0.0  ;;  %v4677_v55 = vpop.f32.mrb[43].mxu0 }
 0x15f   :  { %3547 = vmatmul.mubr.msk.f32.gmra.mrb[68].mxu0 %vm676_vm0, %v5541_v44  ;;  %v5543_v44 = vmax.f32 %v4434_v56, 0.0 }
 0x160   :  { %v4684_v61 = vpop.f32.mrb[44].mxu0 }
 0x161   :  { %v5545_v52 = vmax.f32 %v4684_v61, 0.0  ;;  %v4687_v57 = vpop.f32.mrb[45].mxu0 }
 0x163   :  { %3549 = vmatprep.mubr.msk.f32.mxu0 %vm676_vm0, %v5545_v52  ;;  %v5556_v52 = vmax.f32 %v4532_v38, 0.0 }
 0x164   :  { %v4694_v63 = vpop.f32.mrb[46].mxu0 }
 0x165   :  { %v5542_v42 = vmax.f32 %v4694_v63, 0.0  ;;  %v4697_v59 = vpop.f32.mrb[47].mxu0 }
 0x167   :  { %3550 = vmatmul.mubr.msk.f32.gmra.mrb[70].mxu0 %vm676_vm0, %v5542_v42  ;;  %v5548_v42 = vmax.f32 %v4490_v26, 0.0 }
 0x168   :  { %3552 = vmatprep.mubr.msk.f32.mxu0 %vm676_vm0, %v5543_v44  ;;  %v5554_v44 = vmax.f32 %v4518_v34, 0.0 }
 0x16b   :  { %3553 = vmatmul.mubr.msk.f32.gmra.mrb[72].mxu0 %vm676_vm0, %v5544_v0  ;;  %v5553_v0 = vmax.f32 %v4504_v30, 0.0 }
 0x16c   :  { %3555 = vmatprep.mubr.msk.f32.mxu0 %vm676_vm0, %v5547_v2  ;;  %v1415_v2 = vld [vmem:[#allocation2 + $0x30] sm:$0xff] }
 0x16f   :  { %3556 = vmatmul.mubr.msk.f32.gmra.mrb[74].mxu0 %vm676_vm0, %v5546_v4  ;;  %v4735_v4 = vpop.f32.mrb[16].mxu1 }
 0x170   :  { %3558 = vmatprep.mubr.msk.f32.mxu0 %vm676_vm0, %v5548_v42  ;;  %5573 = vst [vmem:[#allocation17_spill] sm:$0xff] %v4735_v4  ;;  %v1416_v42 = vld [vmem:[#allocation2 + $0xa8] sm:$0xff]  ;;  %v4737_v26 = vpop.f32.mrb[17].mxu1 }
 0x171   :  { %5574 = vst [vmem:[#allocation18_spill] sm:$0xff] %v4737_v26  ;;  %v4028_v20 = vpack.c.bf16 %v1416_v42, %v1415_v2  ;;  %v4739_v49 = vpop.f32.mrb[18].mxu1 }
 0x172   :  { %5575 = vst [vmem:[#allocation19_spill] sm:$0xff] %v4739_v49  ;;  %v4741_v30 = vpop.f32.mrb[19].mxu1 }
 0x173   :  { %3559 = vmatmul.mubr.msk.f32.gmra.mrb[76].mxu0 %vm676_vm0, %v5553_v0  ;;  %5576 = vst [vmem:[#allocation20_spill] sm:$0xff] %v4741_v30  ;;  %4029 = vmatprep.subr.bf16.mxu0 %v4028_v20  ;;  %v4743_v0 = vpop.f32.mrb[20].mxu1 }
 0x174   :  { %3561 = vmatprep.mubr.msk.f32.mxu0 %vm676_vm0, %v5554_v44  ;;  %5577 = vst [vmem:[#allocation21_spill] sm:$0xff] %v4743_v0  ;;  %4031 = vmatpush3.bf16.msra.mxu0 %v4028_v20  ;;  %v4745_v44 = vpop.f32.mrb[21].mxu1 }
 0x175   :  { %5578 = vst [vmem:[#allocation22_spill] sm:$0xff] %v4745_v44  ;;  %v4747_v38 = vpop.f32.mrb[22].mxu1 }
 0x176   :  { %5579 = vst [vmem:[#allocation23_spill] sm:$0xff] %v4747_v38 }
 0x177   :  { %3562 = vmatmul.mubr.msk.f32.gmra.mrb[78].mxu0 %vm676_vm0, %v5556_v52  ;;  %v4749_v52 = vpop.f32.mrb[23].mxu1 }
 0x178   :  { %5580 = vst [vmem:[#allocation24_spill] sm:$0xff] %v4749_v52  ;;  %v4751_v4 = vpop.f32.mrb[24].mxu1 }
 0x179   :  { %5581 = vst [vmem:[#allocation25_spill] sm:$0xff] %v4751_v4  ;;  %v4753_v34 = vpop.f32.mrb[25].mxu1 }
 0x17a   :  { %5582 = vst [vmem:[#allocation26_spill] sm:$0xff] %v4753_v34  ;;  %v4755_v26 = vpop.f32.mrb[26].mxu1 }
 0x17b   :  { %5583 = vst [vmem:[#allocation27_spill] sm:$0xff] %v4755_v26  ;;  %v4757_v42 = vpop.f32.mrb[27].mxu1 }
 0x17c   :  { %5584 = vst [vmem:[#allocation28_spill] sm:$0xff] %v4757_v42  ;;  %v4759_v2 = vpop.f32.mrb[28].mxu1 }
 0x17d   :  { %5585 = vst [vmem:[#allocation29_spill] sm:$0xff] %v4759_v2  ;;  %v4761_v30 = vpop.f32.mrb[29].mxu1 }
 0x17e   :  { %5586 = vst [vmem:[#allocation30_spill] sm:$0xff] %v4761_v30  ;;  %v4763_v0 = vpop.f32.mrb[30].mxu1 }
 0x17f   :  { %5587 = vst [vmem:[#allocation31_spill] sm:$0xff] %v4763_v0  ;;  %v4765_v20 = vpop.f32.mrb[31].mxu1 }
 0x180   :  { %5588 = vst [vmem:[#allocation32_spill] sm:$0xff] %v4765_v20  ;;  %v4767_v44 = vpop.f32.mrb[32].mxu1 }
 0x181   :  { %5589 = vst [vmem:[#allocation33_spill] sm:$0xff] %v4767_v44  ;;  %v4769_v52 = vpop.f32.mrb[33].mxu1 }
 0x182   :  { %5590 = vst [vmem:[#allocation34_spill] sm:$0xff] %v4769_v52  ;;  %v4772_v49 = vpop.f32.mrb[34].mxu1 }
 0x183   :  { %v4775_v26 = vpop.f32.mrb[35].mxu1 }
 0x184   :  { %5591 = vst [vmem:[#allocation35_spill] sm:$0xff] %v4775_v26  ;;  %v4777_v2 = vpop.f32.mrb[36].mxu1 }
 0x185   :  { %v4779_v0 = vpop.f32.mrb[37].mxu1 }
 0x186   :  { %5592 = vst [vmem:[#allocation36_spill] sm:$0xff] %v4779_v0  ;;  %v4782_v44 = vpop.f32.mrb[38].mxu1 }
 0x1e2   :  { %v3518_v38 = vpop.f32.mrb[48].mxu0 }
 0x1e3   :  { %v845_v4 = vadd.f32 %v3518_v38, %v4451_v47  ;;  %v839_v34 = vpop.f32.mrb[49].mxu0  ;;  %v4785_v47 = vpop.f32.mrb[39].mxu1 }
 0x1e4   :  { %v840_v42 = vadd.f32 %v839_v34, %v4437_v60  ;;  %5593 = vst [vmem:[#allocation37_spill] sm:$0xff] %v4785_v47  ;;  %v4789_v26 = vpop.f32.mrb[40].mxu1 }
 0x1e5   :  { %v999_v20 = vmax.f32 %v845_v4, 0.0  ;;  %5594 = vst [vmem:[#allocation38_spill] sm:$0xff] %v4789_v26 }
 0x1e6   :  { %v998_v30 = vmax.f32 %v840_v42, 0.0  ;;  %v4791_v42 = vpop.f32.mrb[41].mxu1 }
 0x1e7   :  { %5595 = vst [vmem:[#allocation39_spill] sm:$0xff] %v4791_v42 }
 0x1e8   :  { %3572 = vmatprep.mubr.msk.f32.mxu1 %vm676_vm0, %v998_v30  ;;  %v4794_v30 = vpop.f32.mrb[42].mxu1 }
 0x1e9   :  { %3573 = vmatmul.mubr.msk.f32.vlgmr.msra.gmra.mrb[80].mxu1 %vm676_vm0, %v999_v20  ;;  %v4797_v20 = vpop.f32.mrb[43].mxu1 }
 0x1ea   :  { %v3521_v38 = vpop.f32.mrb[50].mxu0  ;;  %5596 = vst [vmem:[#allocation40_spill] sm:$0xff] %v4797_v20 }
 0x1eb   :  { %v855_v52 = vadd.f32 %v3521_v38, %v4479_v24  ;;  %v849_v60 = vpop.f32.mrb[51].mxu0 }
 0x1ec   :  { %v850_v34 = vadd.f32 %v849_v60, %v4465_v51  ;;  %v4801_v60 = vpop.f32.mrb[44].mxu1 }
 0x1ed   :  { %v1001_v4 = vmax.f32 %v855_v52, 0.0  ;;  %v4803_v26 = vpop.f32.mrb[45].mxu1 }
 0x1ee   :  { %v1000_v0 = vmax.f32 %v850_v34, 0.0  ;;  %5597 = vst [vmem:[#allocation41_spill] sm:$0xff] %v4803_v26 }
 0x1f0   :  { %3575 = vmatprep.mubr.msk.f32.mxu1 %vm676_vm0, %v1000_v0  ;;  %v4806_v0 = vpop.f32.mrb[46].mxu1 }
 0x1f1   :  { %3576 = vmatmul.mubr.msk.f32.gmra.mrb[82].mxu1 %vm676_vm0, %v1001_v4  ;;  %v4809_v4 = vpop.f32.mrb[47].mxu1 }
 0x1f2   :  { %v3524_v47 = vpop.f32.mrb[52].mxu0  ;;  %5598 = vst [vmem:[#allocation42_spill] sm:$0xff] %v4809_v4 }
 0x1f3   :  { %v865_v24 = vadd.f32 %v3524_v47, %v4507_v32  ;;  %v859_v38 = vpop.f32.mrb[53].mxu0 }
 0x1f4   :  { %v860_v51 = vadd.f32 %v859_v38, %v4493_v28  ;;  %v4813_v38 = vpop.f32.mrb[48].mxu1 }
 0x1f5   :  { %v1003_v52 = vmax.f32 %v865_v24, 0.0  ;;  %v4815_v20 = vpop.f32.mrb[49].mxu1 }
 0x1f6   :  { %v1002_v34 = vmax.f32 %v860_v51, 0.0  ;;  %5599 = vst [vmem:[#allocation43_spill] sm:$0xff] %v4815_v20 }
 0x1f8   :  { %3578 = vmatprep.mubr.msk.f32.mxu1 %vm676_vm0, %v1002_v34  ;;  %v4818_v34 = vpop.f32.mrb[50].mxu1 }
 0x1f9   :  { %3579 = vmatmul.mubr.msk.f32.gmra.mrb[84].mxu1 %vm676_vm0, %v1003_v52  ;;  %v4821_v52 = vpop.f32.mrb[51].mxu1 }
 0x1fa   :  { %v3527_v42 = vpop.f32.mrb[54].mxu0  ;;  %5600 = vst [vmem:[#allocation44_spill] sm:$0xff] %v4821_v52 }
 0x1fb   :  { %v875_v32 = vadd.f32 %v3527_v42, %v4535_v40  ;;  %v869_v47 = vpop.f32.mrb[55].mxu0 }
 0x1fc   :  { %v870_v28 = vadd.f32 %v869_v47, %v4521_v36  ;;  %v4825_v47 = vpop.f32.mrb[52].mxu1 }
 0x1fd   :  { %v1005_v24 = vmax.f32 %v875_v32, 0.0  ;;  %v4827_v4 = vpop.f32.mrb[53].mxu1 }
 0x1fe   :  { %v1004_v51 = vmax.f32 %v870_v28, 0.0  ;;  %5601 = vst [vmem:[#allocation45_spill] sm:$0xff] %v4827_v4 }
 0x200   :  { %3581 = vmatprep.mubr.msk.f32.mxu1 %vm676_vm0, %v1004_v51  ;;  %v4830_v51 = vpop.f32.mrb[54].mxu1 }
 0x201   :  { %3582 = vmatmul.mubr.msk.f32.gmra.mrb[86].mxu1 %vm676_vm0, %v1005_v24  ;;  %v4833_v24 = vpop.f32.mrb[55].mxu1 }
 0x202   :  { %v3530_v26 = vpop.f32.mrb[56].mxu0  ;;  %5602 = vst [vmem:[#allocation46_spill] sm:$0xff] %v4833_v24 }
 0x203   :  { %v885_v40 = vadd.f32 %v3530_v26, %v4557_v45  ;;  %v879_v42 = vpop.f32.mrb[57].mxu0 }
 0x204   :  { %v880_v36 = vadd.f32 %v879_v42, %v4547_v43  ;;  %v4837_v42 = vpop.f32.mrb[56].mxu1 }
 0x205   :  { %v1007_v32 = vmax.f32 %v885_v40, 0.0  ;;  %v4839_v52 = vpop.f32.mrb[57].mxu1 }
 0x206   :  { %v1006_v28 = vmax.f32 %v880_v36, 0.0  ;;  %5603 = vst [vmem:[#allocation47_spill] sm:$0xff] %v4839_v52 }
 0x208   :  { %3584 = vmatprep.mubr.msk.f32.mxu1 %vm676_vm0, %v1006_v28  ;;  %v4842_v28 = vpop.f32.mrb[58].mxu1 }
 0x209   :  { %3585 = vmatmul.mubr.msk.f32.gmra.mrb[88].mxu1 %vm676_vm0, %v1007_v32  ;;  %v4845_v32 = vpop.f32.mrb[59].mxu1 }
 0x20a   :  { %v3533_v20 = vpop.f32.mrb[58].mxu0  ;;  %5604 = vst [vmem:[#allocation48_spill] sm:$0xff] %v4845_v32 }
 0x20b   :  { %v895_v26 = vadd.f32 %v3533_v20, %v4577_v35  ;;  %v889_v45 = vpop.f32.mrb[59].mxu0 }
 0x20c   :  { %v890_v43 = vadd.f32 %v889_v45, %v4567_v39  ;;  %v4849_v45 = vpop.f32.mrb[60].mxu1 }
 0x20d   :  { %v1009_v40 = vmax.f32 %v895_v26, 0.0  ;;  %v4851_v24 = vpop.f32.mrb[61].mxu1 }
 0x20e   :  { %v1008_v36 = vmax.f32 %v890_v43, 0.0  ;;  %5605 = vst [vmem:[#allocation49_spill] sm:$0xff] %v4851_v24 }
 0x210   :  { %3587 = vmatprep.mubr.msk.f32.mxu1 %vm676_vm0, %v1008_v36  ;;  %v4854_v36 = vpop.f32.mrb[62].mxu1 }
 0x211   :  { %3588 = vmatmul.mubr.msk.f32.gmra.mrb[90].mxu1 %vm676_vm0, %v1009_v40  ;;  %v4857_v40 = vpop.f32.mrb[63].mxu1 }
 0x212   :  { %v3536_v4 = vpop.f32.mrb[60].mxu0  ;;  %5606 = vst [vmem:[#allocation50_spill] sm:$0xff] %v4857_v40 }
 0x213   :  { %v905_v35 = vadd.f32 %v3536_v4, %v4597_v27  ;;  %v899_v20 = vpop.f32.mrb[61].mxu0 }
 0x214   :  { %v900_v39 = vadd.f32 %v899_v20, %v4587_v31  ;;  %v4861_v20 = vpop.f32.mrb[64].mxu1 }
 0x215   :  { %v1011_v26 = vmax.f32 %v905_v35, 0.0  ;;  %v4863_v32 = vpop.f32.mrb[65].mxu1 }
 0x216   :  { %v1010_v43 = vmax.f32 %v900_v39, 0.0  ;;  %5607 = vst [vmem:[#allocation51_spill] sm:$0xff] %v4863_v32 }
 0x218   :  { %3590 = vmatprep.mubr.msk.f32.mxu1 %vm676_vm0, %v1010_v43  ;;  %v4866_v43 = vpop.f32.mrb[66].mxu1 }
 0x219   :  { %3591 = vmatmul.mubr.msk.f32.gmra.mrb[92].mxu1 %vm676_vm0, %v1011_v26  ;;  %v4869_v26 = vpop.f32.mrb[67].mxu1 }
 0x21a   :  { %v3539_v52 = vpop.f32.mrb[62].mxu0  ;;  %5608 = vst [vmem:[#allocation52_spill] sm:$0xff] %v4869_v26 }
 0x21b   :  { %v915_v27 = vadd.f32 %v3539_v52, %v4617_v50  ;;  %v909_v4 = vpop.f32.mrb[63].mxu0 }
 0x21c   :  { %v910_v31 = vadd.f32 %v909_v4, %v4607_v21  ;;  %v4873_v4 = vpop.f32.mrb[68].mxu1 }
 0x21d   :  { %v1013_v35 = vmax.f32 %v915_v27, 0.0  ;;  %v4875_v40 = vpop.f32.mrb[69].mxu1 }
 0x21e   :  { %v1012_v39 = vmax.f32 %v910_v31, 0.0  ;;  %5609 = vst [vmem:[#allocation53_spill] sm:$0xff] %v4875_v40 }
 0x220   :  { %3593 = vmatprep.mubr.msk.f32.mxu1 %vm676_vm0, %v1012_v39  ;;  %v4878_v39 = vpop.f32.mrb[70].mxu1 }
 0x221   :  { %3594 = vmatmul.mubr.msk.f32.gmra.mrb[94].mxu1 %vm676_vm0, %v1013_v35  ;;  %v4881_v35 = vpop.f32.mrb[71].mxu1 }
 0x222   :  { %v3542_v24 = vpop.f32.mrb[64].mxu0  ;;  %5610 = vst [vmem:[#allocation54_spill] sm:$0xff] %v4881_v35 }
 0x223   :  { %v925_v50 = vadd.f32 %v3542_v24, %v4637_v58  ;;  %v919_v52 = vpop.f32.mrb[65].mxu0 }
 0x224   :  { %v920_v21 = vadd.f32 %v919_v52, %v4627_v46  ;;  %v4885_v52 = vpop.f32.mrb[72].mxu1 }
 0x225   :  { %v1015_v27 = vmax.f32 %v925_v50, 0.0  ;;  %5611 = vst [vmem:[#allocation55_spill] sm:$0xff] %v4885_v52  ;;  %v4887_v26 = vpop.f32.mrb[73].mxu1 }
 0x226   :  { %v1014_v31 = vmax.f32 %v920_v21, 0.0  ;;  %5612 = vst [vmem:[#allocation56_spill] sm:$0xff] %v4887_v26 }
 0x228   :  { %3596 = vmatprep.mubr.msk.f32.mxu1 %vm676_vm0, %v1014_v31  ;;  %v4890_v31 = vpop.f32.mrb[74].mxu1 }
 0x229   :  { %3597 = vmatmul.mubr.msk.f32.gmra.mrb[96].mxu1 %vm676_vm0, %v1015_v27  ;;  %v4893_v27 = vpop.f32.mrb[75].mxu1 }
 0x22a   :  { %v3545_v32 = vpop.f32.mrb[66].mxu0  ;;  %5613 = vst [vmem:[#allocation57_spill] sm:$0xff] %v4893_v27 }
 0x22b   :  { %v935_v58 = vadd.f32 %v3545_v32, %v4657_v23  ;;  %v929_v24 = vpop.f32.mrb[67].mxu0 }
 0x22c   :  { %v930_v46 = vadd.f32 %v929_v24, %v4647_v22  ;;  %v4897_v24 = vpop.f32.mrb[76].mxu1 }
 0x22d   :  { %v1017_v50 = vmax.f32 %v935_v58, 0.0  ;;  %5614 = vst [vmem:[#allocation58_spill] sm:$0xff] %v4897_v24  ;;  %v4899_v35 = vpop.f32.mrb[77].mxu1  ;;  %v1417_v24 = vld [vmem:[#allocation2 + $0x120] sm:$0xff] }
 0x22e   :  { %v1016_v21 = vmax.f32 %v930_v46, 0.0  ;;  %5615 = vst [vmem:[#allocation59_spill] sm:$0xff] %v4899_v35  ;;  %v1418_v35 = vld [vmem:[#allocation2 + $0x198] sm:$0xff] }
 0x22f   :  { %v4032_v52 = vpack.c.bf16 %v1418_v35, %v1417_v24 }
 0x230   :  { %3599 = vmatprep.mubr.msk.f32.mxu1 %vm676_vm0, %v1016_v21  ;;  %v4902_v21 = vpop.f32.mrb[78].mxu1 }
 0x231   :  { %3600 = vmatmul.mubr.msk.f32.gmra.mrb[98].mxu1 %vm676_vm0, %v1017_v50  ;;  %5616 = vst [vmem:[#allocation60_spill] sm:$0xff] %v4902_v21  ;;  %v4905_v50 = vpop.f32.mrb[79].mxu1  ;;  %4033 = vmatprep.subr.bf16.mxu0 %v4032_v52 }
 0x232   :  { %v3548_v40 = vpop.f32.mrb[68].mxu0  ;;  %5617 = vst [vmem:[#allocation61_spill] sm:$0xff] %v4905_v50  ;;  %4035 = vmatpush3.bf16.msra.mxu0 %v4032_v52 }
 0x233   :  { %v945_v23 = vadd.f32 %v3548_v40, %v4677_v55  ;;  %v939_v32 = vpop.f32.mrb[69].mxu0 }
 0x234   :  { %v940_v22 = vadd.f32 %v939_v32, %v4667_v53 }
 0x235   :  { %v1019_v58 = vmax.f32 %v945_v23, 0.0 }
 0x236   :  { %v1018_v46 = vmax.f32 %v940_v22, 0.0 }
 0x238   :  { %3602 = vmatprep.mubr.msk.f32.mxu1 %vm676_vm0, %v1018_v46 }
 0x239   :  { %3603 = vmatmul.mubr.msk.f32.gmra.mrb[100].mxu1 %vm676_vm0, %v1019_v58 }
 0x23a   :  { %v3551_v26 = vpop.f32.mrb[70].mxu0 }
 0x23b   :  { %v955_v55 = vadd.f32 %v3551_v26, %v4697_v59  ;;  %v949_v40 = vpop.f32.mrb[71].mxu0 }
 0x23c   :  { %v950_v53 = vadd.f32 %v949_v40, %v4687_v57 }
 0x23d   :  { %v1021_v22 = vmax.f32 %v955_v55, 0.0 }
 0x23e   :  { %v1020_v32 = vmax.f32 %v950_v53, 0.0  ;;  %v3554_v27 = vpop.f32.mrb[72].mxu0 }
 0x23f   :  { %v965_v23 = vadd.f32 %v3554_v27, %v4453_v48  ;;  %v959_v46 = vpop.f32.mrb[73].mxu0 }
 0x240   :  { %v960_v21 = vadd.f32 %v959_v46, %v4439_v62  ;;  %3605 = vmatprep.mubr.msk.f32.mxu1 %vm676_vm0, %v1020_v32  ;;  %v1420_v46 = vld [vmem:[#allocation2 + $0xb0] sm:$0xff] }
 0x241   :  { %3606 = vmatmul.mubr.msk.f32.gmra.mrb[102].mxu1 %vm676_vm0, %v1021_v22  ;;  %v1023_v57 = vmax.f32 %v965_v23, 0.0 }
 0x242   :  { %v1022_v59 = vmax.f32 %v960_v21, 0.0  ;;  %v3557_v26 = vpop.f32.mrb[74].mxu0 }
 0x243   :  { %v975_v58 = vadd.f32 %v3557_v26, %v4481_v25  ;;  %v969_v40 = vpop.f32.mrb[75].mxu0  ;;  %v4927_v26 = vld [vmem:[#allocation2 + $0x58] ss:$0 sm:$0xff] }
 0x244   :  { %v970_v55 = vadd.f32 %v969_v40, %v4467_v19  ;;  %3608 = vmatprep.mubr.msk.f32.mxu1 %vm676_vm0, %v1022_v59 }
 0x245   :  { %3609 = vmatmul.mubr.msk.f32.gmra.mrb[104].mxu1 %vm676_vm0, %v1023_v57  ;;  %v1025_v35 = vmax.f32 %v975_v58, 0.0 }
 0x246   :  { %v1024_v48 = vmax.f32 %v970_v55, 0.0  ;;  %v3560_v62 = vpop.f32.mrb[76].mxu0 }
 0x247   :  { %v985_v27 = vadd.f32 %v3560_v62, %v4509_v33  ;;  %v979_v24 = vpop.f32.mrb[77].mxu0 }
 0x248   :  { %v980_v21 = vadd.f32 %v979_v24, %v4495_v29  ;;  %3611 = vmatprep.mubr.msk.f32.mxu1 %vm676_vm0, %v1024_v48  ;;  %v1419_v29 = vld [vmem:[#allocation2 + $0x38] sm:$0xff]  ;;  %v5618_v48 = vmax.f32 %v4432_v54, 0.0 }
 0x249   :  { %3612 = vmatmul.mubr.msk.f32.gmra.mrb[106].mxu1 %vm676_vm0, %v1025_v35  ;;  %v1027_v53 = vmax.f32 %v985_v27, 0.0  ;;  %v4036_v59 = vpack.c.bf16 %v1420_v46, %v1419_v29  ;;  %v5619_v35 = vmax.f32 %v4446_v1, 0.0  ;;  %v5621_v1 = vmax.f32 %v4474_v6, 0.0 }
 0x24a   :  { %v1026_v25 = vmax.f32 %v980_v21, 0.0  ;;  %v3563_v52 = vpop.f32.mrb[78].mxu0  ;;  %v5623_v6 = vmax.f32 %v4502_v8, 0.0  ;;  %v5625_v8 = vmax.f32 %v4530_v10, 0.0  ;;  %v5627_v10 = vmax.f32 %v4554_v12, 0.0 }
 0x24b   :  { %v995_v19 = vadd.f32 %v3563_v52, %v4537_v41  ;;  %v989_v32 = vpop.f32.mrb[79].mxu0  ;;  %4037 = vmatprep.subr.bf16.mxu1 %v4036_v59  ;;  %v5629_v12 = vmax.f32 %v4574_v14, 0.0  ;;  %v5631_v14 = vmax.f32 %v4594_v16, 0.0  ;;  %v5633_v16 = vmax.f32 %v4614_v18, 0.0  ;;  %v5636_v18 = vld [vmem:[#allocation12_spill] sm:$0xff] }
 0x24c   :  { %v990_v22 = vadd.f32 %v989_v32, %v4523_v37  ;;  %3614 = vmatprep.mubr.msk.f32.mxu1 %vm676_vm0, %v1026_v25  ;;  %4039 = vmatpush3.bf16.msra.mxu1 %v4036_v59 }
 0x24d   :  { %3615 = vmatmul.mubr.msk.f32.gmra.mrb[108].mxu1 %vm676_vm0, %v1027_v53  ;;  %v1029_v23 = vmax.f32 %v995_v19, 0.0  ;;  %v5620_v19 = vmax.f32 %v4460_v5, 0.0 }
 0x24e   :  { %v1028_v33 = vmax.f32 %v990_v22, 0.0 }
 0x250   :  { %3617 = vmatprep.mubr.msk.f32.mxu1 %vm676_vm0, %v1028_v33 }
 0x251   :  { %3618 = vmatmul.mubr.msk.f32.gmra.mrb[110].mxu1 %vm676_vm0, %v1029_v23 }
 0x2bc   :  { %v3574_v41 = vpop.f32.mrb[80].mxu1 }
 0x2bd   :  { %v1198_v37 = vadd.f32 %v3574_v41, %v4927_v26  ;;  %v1192_v57 = vpop.f32.mrb[81].mxu1  ;;  %v5622_v41 = vmax.f32 %v4488_v7, 0.0 }
 0x2be   :  { %v1193_v58 = vadd.f32 %v1192_v57, %v4927_v26 }
 0x2bf   :  { %v1352_v40 = vmax.f32 %v1198_v37, 0.0 }
 0x2c0   :  { %v1351_v55 = vmax.f32 %v1193_v58, 0.0 }
 0x2c1   :  { %v4937_v27 = vadd.f32 %v1352_v40, %v5619_v35 }
 0x2c2   :  { %v4933_v62 = vadd.f32 %v1351_v55, %v5618_v48 }
 0x2c4   :  { %v3577_v24 = vpop.f32.mrb[82].mxu1  ;;  %3628 = vmatprep.mubr.msk.f32.mxu0 %vm676_vm0, %v4933_v62 }
 0x2c5   :  { %v1208_v21 = vadd.f32 %v3577_v24, %v4927_v26  ;;  %v1202_v25 = vpop.f32.mrb[83].mxu1  ;;  %3629 = vmatmul.mubr.msk.f32.vlgmr.msra.gmra.mrb[80].mxu0 %vm676_vm0, %v4937_v27  ;;  %v5624_v24 = vmax.f32 %v4516_v9, 0.0 }
 0x2c6   :  { %v1203_v52 = vadd.f32 %v1202_v25, %v4927_v26 }
 0x2c7   :  { %v1354_v53 = vmax.f32 %v1208_v21, 0.0 }
 0x2c8   :  { %v1353_v54 = vmax.f32 %v1203_v52, 0.0 }
 0x2c9   :  { %v4951_v22 = vadd.f32 %v1354_v53, %v5621_v1 }
 0x2ca   :  { %v4947_v32 = vadd.f32 %v1353_v54, %v5620_v19 }
 0x2cc   :  { %v3580_v33 = vpop.f32.mrb[84].mxu1  ;;  %3631 = vmatprep.mubr.msk.f32.mxu0 %vm676_vm0, %v4947_v32 }
 0x2cd   :  { %v1218_v23 = vadd.f32 %v3580_v33, %v4927_v26  ;;  %v1212_v29 = vpop.f32.mrb[85].mxu1  ;;  %3632 = vmatmul.mubr.msk.f32.gmra.mrb[82].mxu0 %vm676_vm0, %v4951_v22  ;;  %v5626_v33 = vmax.f32 %v4544_v11, 0.0 }
 0x2ce   :  { %v1213_v46 = vadd.f32 %v1212_v29, %v4927_v26 }
 0x2cf   :  { %v1356_v59 = vmax.f32 %v1218_v23, 0.0 }
 0x2d0   :  { %v1355_v5 = vmax.f32 %v1213_v46, 0.0 }
 0x2d1   :  { %v4965_v57 = vadd.f32 %v1356_v59, %v5623_v6 }
 0x2d2   :  { %v4961_v37 = vadd.f32 %v1355_v5, %v5622_v41 }
 0x2d4   :  { %v3583_v58 = vpop.f32.mrb[86].mxu1  ;;  %3634 = vmatprep.mubr.msk.f32.mxu0 %vm676_vm0, %v4961_v37 }
 0x2d5   :  { %v1228_v40 = vadd.f32 %v3583_v58, %v4927_v26  ;;  %v1222_v55 = vpop.f32.mrb[87].mxu1  ;;  %3635 = vmatmul.mubr.msk.f32.gmra.mrb[84].mxu0 %vm676_vm0, %v4965_v57  ;;  %v5628_v58 = vmax.f32 %v4564_v13, 0.0 }
 0x2d6   :  { %v1223_v48 = vadd.f32 %v1222_v55, %v4927_v26 }
 0x2d7   :  { %v1358_v35 = vmax.f32 %v1228_v40, 0.0 }
 0x2d8   :  { %v1357_v7 = vmax.f32 %v1223_v48, 0.0 }
 0x2d9   :  { %v4979_v25 = vadd.f32 %v1358_v35, %v5625_v8 }
 0x2da   :  { %v4975_v21 = vadd.f32 %v1357_v7, %v5624_v24 }
 0x2dc   :  { %v3586_v52 = vpop.f32.mrb[88].mxu1  ;;  %3637 = vmatprep.mubr.msk.f32.mxu0 %vm676_vm0, %v4975_v21 }
 0x2dd   :  { %v1238_v53 = vadd.f32 %v3586_v52, %v4927_v26  ;;  %v1232_v54 = vpop.f32.mrb[89].mxu1  ;;  %3638 = vmatmul.mubr.msk.f32.gmra.mrb[86].mxu0 %vm676_vm0, %v4979_v25  ;;  %v5630_v52 = vmax.f32 %v4584_v15, 0.0 }
 0x2de   :  { %v1233_v19 = vadd.f32 %v1232_v54, %v4927_v26 }
 0x2df   :  { %v1360_v1 = vmax.f32 %v1238_v53, 0.0 }
 0x2e0   :  { %v1359_v9 = vmax.f32 %v1233_v19, 0.0 }
 0x2e1   :  { %v4993_v29 = vadd.f32 %v1360_v1, %v5627_v10 }
 0x2e2   :  { %v4989_v23 = vadd.f32 %v1359_v9, %v5626_v33 }
 0x2e4   :  { %v3589_v46 = vpop.f32.mrb[90].mxu1  ;;  %3640 = vmatprep.mubr.msk.f32.mxu0 %vm676_vm0, %v4989_v23 }
 0x2e5   :  { %v1248_v59 = vadd.f32 %v3589_v46, %v4927_v26  ;;  %v1242_v5 = vpop.f32.mrb[91].mxu1  ;;  %3641 = vmatmul.mubr.msk.f32.gmra.mrb[88].mxu0 %vm676_vm0, %v4993_v29  ;;  %v5632_v46 = vmax.f32 %v4604_v17, 0.0 }
 0x2e6   :  { %v1243_v41 = vadd.f32 %v1242_v5, %v4927_v26 }
 0x2e7   :  { %v1362_v6 = vmax.f32 %v1248_v59, 0.0 }
 0x2e8   :  { %v1361_v11 = vmax.f32 %v1243_v41, 0.0 }
 0x2e9   :  { %v5007_v55 = vadd.f32 %v1362_v6, %v5629_v12 }
 0x2ea   :  { %v5003_v40 = vadd.f32 %v1361_v11, %v5628_v58 }
 0x2ec   :  { %v3592_v48 = vpop.f32.mrb[92].mxu1  ;;  %3643 = vmatprep.mubr.msk.f32.mxu0 %vm676_vm0, %v5003_v40 }
 0x2ed   :  { %v1258_v35 = vadd.f32 %v3592_v48, %v4927_v26  ;;  %v1252_v7 = vpop.f32.mrb[93].mxu1  ;;  %3644 = vmatmul.mubr.msk.f32.gmra.mrb[90].mxu0 %vm676_vm0, %v5007_v55  ;;  %v5634_v48 = vld [vmem:[#allocation11_spill] sm:$0xff] }
 0x2ee   :  { %v1253_v24 = vadd.f32 %v1252_v7, %v4927_v26 }
 0x2ef   :  { %v1364_v8 = vmax.f32 %v1258_v35, 0.0  ;;  %v5635_v35 = vmax.f32 %v5634_v48, 0.0 }
 0x2f0   :  { %v1363_v13 = vmax.f32 %v1253_v24, 0.0  ;;  %v5637_v24 = vmax.f32 %v5636_v18, 0.0 }
 0x2f1   :  { %v5021_v54 = vadd.f32 %v1364_v8, %v5631_v14 }
 0x2f2   :  { %v5017_v53 = vadd.f32 %v1363_v13, %v5630_v52 }
 0x2f4   :  { %v3595_v19 = vpop.f32.mrb[94].mxu1  ;;  %3646 = vmatprep.mubr.msk.f32.mxu0 %vm676_vm0, %v5017_v53 }
 0x2f5   :  { %v1268_v1 = vadd.f32 %v3595_v19, %v4927_v26  ;;  %v1262_v9 = vpop.f32.mrb[95].mxu1  ;;  %3647 = vmatmul.mubr.msk.f32.gmra.mrb[92].mxu0 %vm676_vm0, %v5021_v54 }
 0x2f6   :  { %v1263_v33 = vadd.f32 %v1262_v9, %v4927_v26 }
 0x2f7   :  { %v1366_v10 = vmax.f32 %v1268_v1, 0.0 }
 0x2f8   :  { %v1365_v15 = vmax.f32 %v1263_v33, 0.0  ;;  %v5638_v33 = vld [vmem:[#allocation13_spill] sm:$0xff] }
 0x2f9   :  { %v5035_v5 = vadd.f32 %v1366_v10, %v5633_v16  ;;  %v5639_v10 = vmax.f32 %v5638_v33, 0.0 }
 0x2fa   :  { %v5031_v59 = vadd.f32 %v1365_v15, %v5632_v46  ;;  %v5640_v46 = vld [vmem:[#allocation14_spill] sm:$0xff] }
 0x2fb   :  { %v5641_v16 = vmax.f32 %v5640_v46, 0.0 }
 0x2fc   :  { %v3598_v41 = vpop.f32.mrb[96].mxu1  ;;  %3649 = vmatprep.mubr.msk.f32.mxu0 %vm676_vm0, %v5031_v59 }
 0x2fd   :  { %v1278_v6 = vadd.f32 %v3598_v41, %v4927_v26  ;;  %v1272_v11 = vpop.f32.mrb[97].mxu1  ;;  %3650 = vmatmul.mubr.msk.f32.gmra.mrb[94].mxu0 %vm676_vm0, %v5035_v5 }
 0x2fe   :  { %v1273_v58 = vadd.f32 %v1272_v11, %v4927_v26 }
 0x2ff   :  { %v1368_v12 = vmax.f32 %v1278_v6, 0.0 }
 0x300   :  { %v1367_v17 = vmax.f32 %v1273_v58, 0.0 }
 0x301   :  { %v5049_v8 = vadd.f32 %v1368_v12, %v5637_v24 }
 0x302   :  { %v5045_v7 = vadd.f32 %v1367_v17, %v5635_v35  ;;  %v5642_v35 = vld [vmem:[#allocation15_spill] sm:$0xff] }
 0x303   :  { %v5643_v18 = vmax.f32 %v5642_v35, 0.0 }
 0x304   :  { %v3601_v13 = vpop.f32.mrb[98].mxu1  ;;  %3652 = vmatprep.mubr.msk.f32.mxu0 %vm676_vm0, %v5045_v7 }
 0x305   :  { %v1288_v52 = vadd.f32 %v3601_v13, %v4927_v26  ;;  %v1282_v14 = vpop.f32.mrb[99].mxu1  ;;  %3653 = vmatmul.mubr.msk.f32.gmra.mrb[96].mxu0 %vm676_vm0, %v5049_v8  ;;  %v5644_v13 = vld [vmem:[#allocation16_spill] sm:$0xff] }
 0x306   :  { %v1283_v19 = vadd.f32 %v1282_v14, %v4927_v26 }
 0x307   :  { %v1370_v1 = vmax.f32 %v1288_v52, 0.0  ;;  %v5645_v52 = vmax.f32 %v5644_v13, 0.0  ;;  %v5647_v13 = vmax.f32 %v4694_v63, 0.0 }
 0x308   :  { %v1369_v9 = vmax.f32 %v1283_v19, 0.0 }
 0x309   :  { %v5063_v41 = vadd.f32 %v1370_v1, %v5641_v16 }
 0x30a   :  { %v5059_v15 = vadd.f32 %v1369_v9, %v5639_v10 }
 0x30c   :  { %v3604_v6 = vpop.f32.mrb[100].mxu1  ;;  %3655 = vmatprep.mubr.msk.f32.mxu0 %vm676_vm0, %v5059_v15 }
 0x30d   :  { %v1298_v11 = vadd.f32 %v3604_v6, %v4927_v26  ;;  %v1292_v58 = vpop.f32.mrb[101].mxu1  ;;  %3656 = vmatmul.mubr.msk.f32.gmra.mrb[98].mxu0 %vm676_vm0, %v5063_v41  ;;  %v1421_v6 = vld [vmem:[#allocation2 + $0x128] sm:$0xff] }
 0x30e   :  { %v1293_v12 = vadd.f32 %v1292_v58, %v4927_v26 }
 0x30f   :  { %v1372_v17 = vmax.f32 %v1298_v11, 0.0  ;;  %v1422_v11 = vld [vmem:[#allocation2 + $0x1a0] sm:$0xff] }
 0x310   :  { %v1371_v48 = vmax.f32 %v1293_v12, 0.0 }
 0x311   :  { %v5077_v14 = vadd.f32 %v1372_v17, %v5645_v52  ;;  %v4040_v17 = vpack.c.bf16 %v1422_v11, %v1421_v6 }
 0x312   :  { %v5073_v24 = vadd.f32 %v1371_v48, %v5643_v18  ;;  %v5646_v48 = vmax.f32 %v4684_v61, 0.0  ;;  %v5648_v61 = vmax.f32 %v4434_v56, 0.0  ;;  %v5650_v56 = vld [vmem:[#allocation5_spill] sm:$0xff] }
 0x313   :  { %4041 = vmatprep.subr.bf16.mxu1 %v4040_v17 }
 0x314   :  { %v3607_v19 = vpop.f32.mrb[102].mxu1  ;;  %3658 = vmatprep.mubr.msk.f32.mxu0 %vm676_vm0, %v5073_v24  ;;  %4043 = vmatpush3.bf16.msra.mxu1 %v4040_v17 }
 0x315   :  { %v1308_v1 = vadd.f32 %v3607_v19, %v4927_v26  ;;  %v1302_v9 = vpop.f32.mrb[103].mxu1  ;;  %3659 = vmatmul.mubr.msk.f32.gmra.mrb[100].mxu0 %vm676_vm0, %v5077_v14 }
 0x316   :  { %v1303_v33 = vadd.f32 %v1302_v9, %v4927_v26 }
 0x317   :  { %v1374_v10 = vmax.f32 %v1308_v1, 0.0 }
 0x318   :  { %v1373_v46 = vmax.f32 %v1303_v33, 0.0  ;;  %v3610_v16 = vpop.f32.mrb[104].mxu1 }
 0x319   :  { %v1318_v58 = vadd.f32 %v3610_v16, %v4927_v26  ;;  %v1312_v12 = vpop.f32.mrb[105].mxu1  ;;  %v5093_v52 = vadd.f32 %v1374_v10, %v5647_v13  ;;  %v5649_v10 = vmax.f32 %v4448_v3, 0.0 }
 0x31a   :  { %v5088_v35 = vadd.f32 %v1373_v46, %v5646_v48  ;;  %v1313_v18 = vadd.f32 %v1312_v12, %v4927_v26 }
 0x31b   :  { %v1376_v19 = vmax.f32 %v1318_v58, 0.0 }
 0x31c   :  { %v1375_v1 = vmax.f32 %v1313_v18, 0.0  ;;  %v3613_v9 = vpop.f32.mrb[106].mxu1  ;;  %3661 = vmatprep.mubr.msk.f32.mxu0 %vm676_vm0, %v5088_v35  ;;  %v5651_v18 = vmax.f32 %v5650_v56, 0.0 }
 0x31d   :  { %v1328_v33 = vadd.f32 %v3613_v9, %v4927_v26  ;;  %v1322_v16 = vpop.f32.mrb[107].mxu1  ;;  %3662 = vmatmul.mubr.msk.f32.gmra.mrb[102].mxu0 %vm676_vm0, %v5093_v52  ;;  %v5107_v6 = vadd.f32 %v1376_v19, %v5649_v10  ;;  %v5652_v19 = vld [vmem:[#allocation6_spill] sm:$0xff] }
 0x31e   :  { %v5102_v46 = vadd.f32 %v1375_v1, %v5648_v61  ;;  %v1323_v63 = vadd.f32 %v1322_v16, %v4927_v26  ;;  %v5653_v1 = vmax.f32 %v5652_v19, 0.0 }
 0x31f   :  { %v1378_v11 = vmax.f32 %v1328_v33, 0.0 }
 0x320   :  { %v1377_v58 = vmax.f32 %v1323_v63, 0.0  ;;  %v3616_v12 = vpop.f32.mrb[108].mxu1  ;;  %3664 = vmatprep.mubr.msk.f32.mxu0 %vm676_vm0, %v5102_v46 }
 0x321   :  { %v1338_v17 = vadd.f32 %v3616_v12, %v4927_v26  ;;  %v1332_v48 = vpop.f32.mrb[109].mxu1  ;;  %3665 = vmatmul.mubr.msk.f32.gmra.mrb[104].mxu0 %vm676_vm0, %v5107_v6  ;;  %v5121_v9 = vadd.f32 %v1378_v11, %v5653_v1  ;;  %v5656_v11 = vld [vmem:[#allocation8_spill] sm:$0xff]  ;;  %v5659_v1 = vld [vmem:[#allocation9_spill] sm:$0xff] }
 0x322   :  { %v5116_v13 = vadd.f32 %v1377_v58, %v5651_v18  ;;  %v1333_v3 = vadd.f32 %v1332_v48, %v4927_v26  ;;  %v5654_v58 = vld [vmem:[#allocation7_spill] sm:$0xff]  ;;  %v5657_v18 = vmax.f32 %v5656_v11, 0.0 }
 0x323   :  { %v1380_v33 = vmax.f32 %v1338_v17, 0.0  ;;  %v5655_v12 = vmax.f32 %v5654_v58, 0.0 }
 0x324   :  { %v1379_v16 = vmax.f32 %v1333_v3, 0.0  ;;  %v3619_v61 = vpop.f32.mrb[110].mxu1  ;;  %3667 = vmatprep.mubr.msk.f32.mxu0 %vm676_vm0, %v5116_v13 }
 0x325   :  { %v1348_v63 = vadd.f32 %v3619_v61, %v4927_v26  ;;  %v1342_v10 = vpop.f32.mrb[111].mxu1  ;;  %3668 = vmatmul.mubr.msk.f32.gmra.mrb[106].mxu0 %vm676_vm0, %v5121_v9  ;;  %v5135_v17 = vadd.f32 %v1380_v33, %v5657_v18  ;;  %v5660_v61 = vmax.f32 %v5659_v1, 0.0  ;;  %v2163_v33 = vld [vmem:[#allocation2 + $0xb8] sm:$0xff] }
 0x326   :  { %v5130_v56 = vadd.f32 %v1379_v16, %v5655_v12  ;;  %v1343_v48 = vadd.f32 %v1342_v10, %v4927_v26  ;;  %v5662_v16 = vld [vmem:[#allocation10_spill] sm:$0xff]  ;;  %v2162_v26 = vld [vmem:[#allocation2 + $0x40] sm:$0xff] }
 0x327   :  { %5658 = vst [vmem:[#allocation11_spill] sm:$0xff] %v5135_v17  ;;  %v1382_v3 = vmax.f32 %v1348_v63, 0.0  ;;  %v5663_v58 = vmax.f32 %v5662_v16, 0.0  ;;  %v4044_v63 = vpack.c.bf16 %v2163_v33, %v2162_v26 }
 0x328   :  { %v1381_v19 = vmax.f32 %v1343_v48, 0.0  ;;  %3670 = vmatprep.mubr.msk.f32.mxu0 %vm676_vm0, %v5130_v56  ;;  %v5665_v48 = vld [vmem:[#allocation19_spill] sm:$0xff] }
 0x329   :  { %3671 = vmatmul.mubr.msk.f32.gmra.mrb[108].mxu0 %vm676_vm0, %v5135_v17  ;;  %v5147_v12 = vadd.f32 %v1382_v3, %v5663_v58  ;;  %4045 = vmatprep.subr.bf16.mxu0 %v4044_v63  ;;  %v5667_v58 = vld [vmem:[#allocation23_spill] sm:$0xff]  ;;  %v5668_v17 = vld [vmem:[#allocation21_spill] sm:$0xff] }
 0x32a   :  { %v5143_v50 = vadd.f32 %v1381_v19, %v5660_v61  ;;  %4047 = vmatpush3.bf16.msra.mxu0 %v4044_v63  ;;  %v5666_v19 = vld [vmem:[#allocation17_spill] sm:$0xff] }
 0x32b   :  { %5664 = vst [vmem:[#allocation13_spill] sm:$0xff] %v5147_v12 }
 0x32c   :  { %5661 = vst [vmem:[#allocation12_spill] sm:$0xff] %v5143_v50  ;;  %3673 = vmatprep.mubr.msk.f32.mxu0 %vm676_vm0, %v5143_v50 }
 0x32d   :  { %3674 = vmatmul.mubr.msk.f32.gmra.mrb[110].mxu0 %vm676_vm0, %v5147_v12 }
 0x398   :  { %v3630_v10 = vpop.f32.mrb[80].mxu0 }
 0x399   :  { %v1592_v11 = vadd.f32 %v3630_v10, %v5665_v48  ;;  %v1586_v18 = vpop.f32.mrb[81].mxu0  ;;  %v5669_v48 = vld [vmem:[#allocation27_spill] sm:$0xff] }
 0x39a   :  { %v1587_v1 = vadd.f32 %v1586_v18, %v5666_v19  ;;  %v5670_v19 = vld [vmem:[#allocation25_spill] sm:$0xff] }
 0x39b   :  { %v1746_v3 = vmax.f32 %v1592_v11, 0.0 }
 0x39c   :  { %v1745_v61 = vmax.f32 %v1587_v1, 0.0 }
 0x39e   :  { %3684 = vmatprep.mubr.msk.f32.mxu1 %vm676_vm0, %v1745_v61 }
 0x39f   :  { %3685 = vmatmul.mubr.msk.f32.vlgmr.msra.gmra.mrb[112].mxu1 %vm676_vm0, %v1746_v3 }
 0x3a0   :  { %v3633_v16 = vpop.f32.mrb[82].mxu0 }
 0x3a1   :  { %v1602_v12 = vadd.f32 %v3633_v16, %v5667_v58  ;;  %v1596_v50 = vpop.f32.mrb[83].mxu0  ;;  %v5672_v58 = vld [vmem:[#allocation29_spill] sm:$0xff] }
 0x3a2   :  { %v1597_v26 = vadd.f32 %v1596_v50, %v5668_v17  ;;  %v5671_v50 = vld [vmem:[#allocation31_spill] sm:$0xff] }
 0x3a3   :  { %v1748_v63 = vmax.f32 %v1602_v12, 0.0 }
 0x3a4   :  { %v1747_v33 = vmax.f32 %v1597_v26, 0.0 }
 0x3a6   :  { %3687 = vmatprep.mubr.msk.f32.mxu1 %vm676_vm0, %v1747_v33 }
 0x3a7   :  { %3688 = vmatmul.mubr.msk.f32.gmra.mrb[114].mxu1 %vm676_vm0, %v1748_v63 }
 0x3a8   :  { %v3636_v10 = vpop.f32.mrb[84].mxu0 }
 0x3a9   :  { %v1612_v18 = vadd.f32 %v3636_v10, %v5669_v48  ;;  %v1606_v11 = vpop.f32.mrb[85].mxu0 }
 0x3aa   :  { %v1607_v1 = vadd.f32 %v1606_v11, %v5670_v19  ;;  %v5673_v11 = vld [vmem:[#allocation33_spill] sm:$0xff] }
 0x3ab   :  { %v1750_v3 = vmax.f32 %v1612_v18, 0.0 }
 0x3ac   :  { %v1749_v61 = vmax.f32 %v1607_v1, 0.0 }
 0x3ae   :  { %3690 = vmatprep.mubr.msk.f32.mxu1 %vm676_vm0, %v1749_v61 }
 0x3af   :  { %3691 = vmatmul.mubr.msk.f32.gmra.mrb[116].mxu1 %vm676_vm0, %v1750_v3 }
 0x3b0   :  { %v3639_v16 = vpop.f32.mrb[86].mxu0 }
 0x3b1   :  { %v1622_v17 = vadd.f32 %v3639_v16, %v5671_v50  ;;  %v1616_v12 = vpop.f32.mrb[87].mxu0 }
 0x3b2   :  { %v1617_v26 = vadd.f32 %v1616_v12, %v5672_v58 }
 0x3b3   :  { %v1752_v63 = vmax.f32 %v1622_v17, 0.0 }
 0x3b4   :  { %v1751_v33 = vmax.f32 %v1617_v26, 0.0 }
 0x3b6   :  { %3693 = vmatprep.mubr.msk.f32.mxu1 %vm676_vm0, %v1751_v33 }
 0x3b7   :  { %3694 = vmatmul.mubr.msk.f32.gmra.mrb[118].mxu1 %vm676_vm0, %v1752_v63  ;;  %v5674_v63 = vld [vmem:[#allocation38_spill] sm:$0xff] }
 0x3b8   :  { %v3642_v10 = vpop.f32.mrb[88].mxu0 }
 0x3b9   :  { %v1632_v48 = vadd.f32 %v3642_v10, %v4772_v49  ;;  %v1626_v18 = vpop.f32.mrb[89].mxu0 }
 0x3ba   :  { %v1627_v19 = vadd.f32 %v1626_v18, %v5673_v11 }
 0x3bb   :  { %v1754_v61 = vmax.f32 %v1632_v48, 0.0 }
 0x3bc   :  { %v1753_v1 = vmax.f32 %v1627_v19, 0.0 }
 0x3be   :  { %3696 = vmatprep.mubr.msk.f32.mxu1 %vm676_vm0, %v1753_v1 }
 0x3bf   :  { %3697 = vmatmul.mubr.msk.f32.gmra.mrb[120].mxu1 %vm676_vm0, %v1754_v61 }
 0x3c0   :  { %v3645_v3 = vpop.f32.mrb[90].mxu0 }
 0x3c1   :  { %v1642_v16 = vadd.f32 %v3645_v3, %v4782_v44  ;;  %v1636_v50 = vpop.f32.mrb[91].mxu0 }
 0x3c2   :  { %v1637_v17 = vadd.f32 %v1636_v50, %v4777_v2 }
 0x3c3   :  { %v1756_v58 = vmax.f32 %v1642_v16, 0.0 }
 0x3c4   :  { %v1755_v12 = vmax.f32 %v1637_v17, 0.0 }
 0x3c6   :  { %3699 = vmatprep.mubr.msk.f32.mxu1 %vm676_vm0, %v1755_v12 }
 0x3c7   :  { %3700 = vmatmul.mubr.msk.f32.gmra.mrb[122].mxu1 %vm676_vm0, %v1756_v58 }
 0x3c8   :  { %v3648_v49 = vpop.f32.mrb[92].mxu0 }
 0x3c9   :  { %v1652_v26 = vadd.f32 %v3648_v49, %v4794_v30  ;;  %v1646_v33 = vpop.f32.mrb[93].mxu0 }
 0x3ca   :  { %v1647_v10 = vadd.f32 %v1646_v33, %v5674_v63 }
 0x3cb   :  { %v1758_v18 = vmax.f32 %v1652_v26, 0.0 }
 0x3cc   :  { %v1757_v48 = vmax.f32 %v1647_v10, 0.0 }
 0x3ce   :  { %3702 = vmatprep.mubr.msk.f32.mxu1 %vm676_vm0, %v1757_v48 }
 0x3cf   :  { %3703 = vmatmul.mubr.msk.f32.gmra.mrb[124].mxu1 %vm676_vm0, %v1758_v18 }
 0x3d0   :  { %v3651_v44 = vpop.f32.mrb[94].mxu0 }
 0x3d1   :  { %v1662_v2 = vadd.f32 %v3651_v44, %v4806_v0  ;;  %v1656_v11 = vpop.f32.mrb[95].mxu0 }
 0x3d2   :  { %v1657_v19 = vadd.f32 %v1656_v11, %v4801_v60 }
 0x3d3   :  { %v1760_v61 = vmax.f32 %v1662_v2, 0.0 }
 0x3d4   :  { %v1759_v1 = vmax.f32 %v1657_v19, 0.0 }
 0x3d6   :  { %3705 = vmatprep.mubr.msk.f32.mxu1 %vm676_vm0, %v1759_v1  ;;  %v2164_v1 = vld [vmem:[#allocation2 + $0x130] sm:$0xff] }
 0x3d7   :  { %3706 = vmatmul.mubr.msk.f32.gmra.mrb[126].mxu1 %vm676_vm0, %v1760_v61  ;;  %v2165_v61 = vld [vmem:[#allocation2 + $0x1a8] sm:$0xff] }
 0x3d8   :  { %v3654_v30 = vpop.f32.mrb[96].mxu0 }
 0x3d9   :  { %v1672_v3 = vadd.f32 %v3654_v30, %v4818_v34  ;;  %v1666_v16 = vpop.f32.mrb[97].mxu0 }
 0x3da   :  { %v1667_v50 = vadd.f32 %v1666_v16, %v4813_v38 }
 0x3db   :  { %v1762_v12 = vmax.f32 %v1672_v3, 0.0  ;;  %v4048_v3 = vpack.c.bf16 %v2165_v61, %v2164_v1  ;;  %v2170_v61 = vld [vmem:[#allocation2 + $0x228] sm:$0xff] }
 0x3dc   :  { %v1761_v17 = vmax.f32 %v1667_v50, 0.0 }
 0x3dd   :  { %4049 = vmatprep.subr.bf16.mxu0 %v4048_v3 }
 0x3de   :  { %3708 = vmatprep.mubr.msk.f32.mxu1 %vm676_vm0, %v1761_v17  ;;  %4051 = vmatpush3.bf16.msra.mxu0 %v4048_v3  ;;  %v2173_v3 = vld [vmem:[#allocation2 + $0x390] sm:$0xff] }
 0x3df   :  { %3709 = vmatmul.mubr.msk.f32.gmra.mrb[128].mxu1 %vm676_vm0, %v1762_v12 }
 0x3e0   :  { %v3657_v0 = vpop.f32.mrb[98].mxu0 }
 0x3e1   :  { %v1682_v60 = vadd.f32 %v3657_v0, %v4830_v51  ;;  %v1676_v58 = vpop.f32.mrb[99].mxu0 }
 0x3e2   :  { %v1677_v49 = vadd.f32 %v1676_v58, %v4825_v47 }
 0x3e3   :  { %v1764_v33 = vmax.f32 %v1682_v60, 0.0 }
 0x3e4   :  { %v1763_v26 = vmax.f32 %v1677_v49, 0.0 }
 0x3e6   :  { %3711 = vmatprep.mubr.msk.f32.mxu1 %vm676_vm0, %v1763_v26  ;;  %v5675_v26 = vld [vmem:[#allocation55_spill] sm:$0xff] }
 0x3e7   :  { %3712 = vmatmul.mubr.msk.f32.gmra.mrb[130].mxu1 %vm676_vm0, %v1764_v33 }
 0x3e8   :  { %v3660_v34 = vpop.f32.mrb[100].mxu0 }
 0x3e9   :  { %v1692_v38 = vadd.f32 %v3660_v34, %v4842_v28  ;;  %v1686_v63 = vpop.f32.mrb[101].mxu0 }
 0x3ea   :  { %v1687_v10 = vadd.f32 %v1686_v63, %v4837_v42 }
 0x3eb   :  { %v1766_v18 = vmax.f32 %v1692_v38, 0.0 }
 0x3ec   :  { %v1765_v48 = vmax.f32 %v1687_v10, 0.0 }
 0x3ee   :  { %3714 = vmatprep.mubr.msk.f32.mxu1 %vm676_vm0, %v1765_v48  ;;  %v5677_v48 = vld [vmem:[#allocation58_spill] sm:$0xff] }
 0x3ef   :  { %3715 = vmatmul.mubr.msk.f32.gmra.mrb[132].mxu1 %vm676_vm0, %v1766_v18 }
 0x3f0   :  { %v3663_v51 = vpop.f32.mrb[102].mxu0 }
 0x3f1   :  { %v1702_v47 = vadd.f32 %v3663_v51, %v4854_v36  ;;  %v1696_v44 = vpop.f32.mrb[103].mxu0 }
 0x3f2   :  { %v1697_v2 = vadd.f32 %v1696_v44, %v4849_v45  ;;  %v2167_v44 = vld [vmem:[#allocation2 + $0xc0] sm:$0xff] }
 0x3f3   :  { %v1768_v28 = vmax.f32 %v1702_v47, 0.0  ;;  %v2166_v47 = vld [vmem:[#allocation2 + $0x48] sm:$0xff] }
 0x3f4   :  { %v1767_v11 = vmax.f32 %v1697_v2, 0.0  ;;  %v3666_v19 = vpop.f32.mrb[104].mxu0  ;;  %v2168_v2 = vld [vmem:[#allocation2 + $0x138] sm:$0xff] }
 0x3f5   :  { %v1712_v30 = vadd.f32 %v3666_v19, %v4866_v43  ;;  %v1706_v42 = vpop.f32.mrb[105].mxu0  ;;  %v2169_v19 = vld [vmem:[#allocation2 + $0x1b0] sm:$0xff] }
 0x3f6   :  { %v1707_v16 = vadd.f32 %v1706_v42, %v4861_v20  ;;  %3717 = vmatprep.mubr.msk.f32.mxu1 %vm676_vm0, %v1767_v11  ;;  %v4052_v11 = vpack.c.bf16 %v2167_v44, %v2166_v47  ;;  %v4056_v1 = vpack.c.bf16 %v2169_v19, %v2168_v2  ;;  %v2172_v42 = vld [vmem:[#allocation2 + $0x318] sm:$0xff] }
 0x3f7   :  { %3718 = vmatmul.mubr.msk.f32.gmra.mrb[134].mxu1 %vm676_vm0, %v1768_v28  ;;  %v1770_v45 = vmax.f32 %v1712_v30, 0.0  ;;  %v2171_v28 = vld [vmem:[#allocation2 + $0x2a0] sm:$0xff] }
 0x3f8   :  { %v1769_v36 = vmax.f32 %v1707_v16, 0.0  ;;  %v3669_v50 = vpop.f32.mrb[106].mxu0  ;;  %4053 = vmatprep.subr.bf16.mxu1 %v4052_v11  ;;  %v4060_v30 = vpack.c.bf16 %v2171_v28, %v2170_v61  ;;  %v4064_v16 = vpack.c.bf16 %v2173_v3, %v2172_v42 }
 0x3f9   :  { %v1722_v17 = vadd.f32 %v3669_v50, %v4878_v39  ;;  %v1716_v12 = vpop.f32.mrb[107].mxu0  ;;  %4055 = vmatpush3.bf16.msra.mxu1 %v4052_v11  ;;  %v2175_v50 = vld [vmem:[#allocation2 + $0x480] sm:$0xff] }
 0x3fa   :  { %v1717_v0 = vadd.f32 %v1716_v12, %v4873_v4  ;;  %3720 = vmatprep.mubr.msk.f32.mxu1 %vm676_vm0, %v1769_v36  ;;  %v5676_v4 = vld [vmem:[#allocation60_spill] sm:$0xff]  ;;  %4057 = vmatprep.subr.bf16.mxu1 %v4056_v1  ;;  %v2174_v36 = vld [vmem:[#allocation2 + $0x408] sm:$0xff] }
 0x3fb   :  { %3721 = vmatmul.mubr.msk.f32.gmra.mrb[136].mxu1 %vm676_vm0, %v1770_v45  ;;  %v1772_v60 = vmax.f32 %v1722_v17, 0.0  ;;  %v5217_v45 = vld [vmem:[#allocation2 + $0x60] ss:$0 sm:$0xff]  ;;  %v4068_v17 = vpack.c.bf16 %v2175_v50, %v2174_v36  ;;  %v2176_v12 = vld [vmem:[#allocation2 + $0x4f8] sm:$0xff] }
 0x3fc   :  { %v1771_v43 = vmax.f32 %v1717_v0, 0.0  ;;  %v3672_v20 = vpop.f32.mrb[108].mxu0  ;;  %v2177_v0 = vld [vmem:[#allocation2 + $0x570] sm:$0xff] }
 0x3fd   :  { %v1732_v58 = vadd.f32 %v3672_v20, %v4890_v31  ;;  %v1726_v49 = vpop.f32.mrb[109].mxu0  ;;  %4059 = vmatpush3.bf16.msra.mxu1 %v4056_v1 }
 0x3fe   :  { %v1727_v33 = vadd.f32 %v1726_v49, %v5675_v26  ;;  %3723 = vmatprep.mubr.msk.f32.mxu1 %vm676_vm0, %v1771_v43  ;;  %4061 = vmatprep.subr.bf16.mxu1 %v4060_v30  ;;  %v4072_v49 = vpack.c.bf16 %v2177_v0, %v2176_v12 }
 0x3ff   :  { %3724 = vmatmul.mubr.msk.f32.gmra.mrb[138].mxu1 %vm676_vm0, %v1772_v60  ;;  %v1774_v38 = vmax.f32 %v1732_v58, 0.0 }
 0x400   :  { %v1773_v39 = vmax.f32 %v1727_v33, 0.0  ;;  %v3675_v34 = vpop.f32.mrb[110].mxu0  ;;  %v2178_v33 = vld [vmem:[#allocation2 + $0x5e8] sm:$0xff] }
 0x401   :  { %v1742_v63 = vadd.f32 %v3675_v34, %v5676_v4  ;;  %v1736_v10 = vpop.f32.mrb[111].mxu0  ;;  %4063 = vmatpush3.bf16.msra.mxu1 %v4060_v30 }
 0x402   :  { %v1737_v18 = vadd.f32 %v1736_v10, %v5677_v48  ;;  %3726 = vmatprep.mubr.msk.f32.mxu1 %vm676_vm0, %v1773_v39  ;;  %4065 = vmatprep.subr.bf16.mxu1 %v4064_v16  ;;  %v2179_v39 = vld [vmem:[#allocation2 + $0x660] sm:$0xff] }
 0x403   :  { %3727 = vmatmul.mubr.msk.f32.gmra.mrb[140].mxu1 %vm676_vm0, %v1774_v38  ;;  %v1776_v51 = vmax.f32 %v1742_v63, 0.0  ;;  %v4076_v4 = vpack.c.bf16 %v2179_v39, %v2178_v33 }
 0x404   :  { %v1775_v31 = vmax.f32 %v1737_v18, 0.0 }
 0x405   :  { %4067 = vmatpush3.bf16.msra.mxu1 %v4064_v16 }
 0x406   :  { %3729 = vmatprep.mubr.msk.f32.mxu1 %vm676_vm0, %v1775_v31  ;;  %4069 = vmatprep.subr.bf16.mxu1 %v4068_v17 }
 0x407   :  { %3730 = vmatmul.mubr.msk.f32.gmra.mrb[142].mxu1 %vm676_vm0, %v1776_v51 }
 0x409   :  { %4071 = vmatpush3.bf16.msra.mxu1 %v4068_v17 }
 0x40a   :  { %4073 = vmatprep.subr.bf16.mxu1 %v4072_v49 }
 0x40d   :  { %4075 = vmatpush3.bf16.msra.mxu1 %v4072_v49 }
 0x40e   :  { %4077 = vmatprep.subr.bf16.mxu1 %v4076_v4 }
 0x411   :  { %4079 = vmatpush3.bf16.msra.mxu1 %v4076_v4 }
 0x472   :  { %v3686_v43 = vpop.f32.mrb[112].mxu1 }
 0x473   :  { %v1945_v20 = vadd.f32 %v3686_v43, %v5217_v45  ;;  %v1939_v60 = vpop.f32.mrb[113].mxu1 }
 0x474   :  { %v1940_v58 = vadd.f32 %v1939_v60, %v5217_v45 }
 0x475   :  { %v2099_v26 = vmax.f32 %v1945_v20, 0.0 }
 0x476   :  { %v2098_v34 = vmax.f32 %v1940_v58, 0.0 }
 0x477   :  { %v2131_v63 = vadd.f32 %v2099_v26, %v4937_v27 }
 0x478   :  { %v2130_v38 = vadd.f32 %v2098_v34, %v4933_v62 }
 0x47a   :  { %v3689_v10 = vpop.f32.mrb[114].mxu1  ;;  %3740 = vmatprep.mubr.msk.f32.mxu0 %vm676_vm0, %v2130_v38 }
 0x47b   :  { %v1955_v48 = vadd.f32 %v3689_v10, %v5217_v45  ;;  %v1949_v18 = vpop.f32.mrb[115].mxu1  ;;  %3741 = vmatmul.mubr.msk.f32.vlgmr.msra.gmra.mrb[112].mxu0 %vm676_vm0, %v2131_v63 }
 0x47c   :  { %v1950_v31 = vadd.f32 %v1949_v18, %v5217_v45 }
 0x47d   :  { %v2101_v51 = vmax.f32 %v1955_v48, 0.0 }
 0x47e   :  { %v2100_v47 = vmax.f32 %v1950_v31, 0.0 }
 0x47f   :  { %v2133_v44 = vadd.f32 %v2101_v51, %v4951_v22 }
 0x480   :  { %v2132_v62 = vadd.f32 %v2100_v47, %v4947_v32 }
 0x482   :  { %v3692_v27 = vpop.f32.mrb[116].mxu1  ;;  %3743 = vmatprep.mubr.msk.f32.mxu0 %vm676_vm0, %v2132_v62 }
 0x483   :  { %v1965_v2 = vadd.f32 %v3692_v27, %v5217_v45  ;;  %v1959_v11 = vpop.f32.mrb[117].mxu1  ;;  %3744 = vmatmul.mubr.msk.f32.gmra.mrb[114].mxu0 %vm676_vm0, %v2133_v44 }
 0x484   :  { %v1960_v19 = vadd.f32 %v1959_v11, %v5217_v45 }
 0x485   :  { %v2103_v1 = vmax.f32 %v1965_v2, 0.0 }
 0x486   :  { %v2102_v61 = vmax.f32 %v1960_v19, 0.0 }
 0x487   :  { %v2135_v30 = vadd.f32 %v2103_v1, %v4965_v57 }
 0x488   :  { %v2134_v28 = vadd.f32 %v2102_v61, %v4961_v37 }
 0x48a   :  { %v3695_v42 = vpop.f32.mrb[118].mxu1  ;;  %3746 = vmatprep.mubr.msk.f32.mxu0 %vm676_vm0, %v2134_v28 }
 0x48b   :  { %v1975_v32 = vadd.f32 %v3695_v42, %v5217_v45  ;;  %v1969_v22 = vpop.f32.mrb[119].mxu1  ;;  %3747 = vmatmul.mubr.msk.f32.gmra.mrb[116].mxu0 %vm676_vm0, %v2135_v30 }
 0x48c   :  { %v1970_v3 = vadd.f32 %v1969_v22, %v5217_v45 }
 0x48d   :  { %v2105_v16 = vmax.f32 %v1975_v32, 0.0 }
 0x48e   :  { %v2104_v36 = vmax.f32 %v1970_v3, 0.0 }
 0x48f   :  { %v2137_v17 = vadd.f32 %v2105_v16, %v4979_v25 }
 0x490   :  { %v2136_v50 = vadd.f32 %v2104_v36, %v4975_v21 }
 0x492   :  { %v3698_v12 = vpop.f32.mrb[120].mxu1  ;;  %3749 = vmatprep.mubr.msk.f32.mxu0 %vm676_vm0, %v2136_v50 }
 0x493   :  { %v1985_v37 = vadd.f32 %v3698_v12, %v5217_v45  ;;  %v1979_v57 = vpop.f32.mrb[121].mxu1  ;;  %3750 = vmatmul.mubr.msk.f32.gmra.mrb[118].mxu0 %vm676_vm0, %v2137_v17 }
 0x494   :  { %v1980_v0 = vadd.f32 %v1979_v57, %v5217_v45 }
 0x495   :  { %v2107_v43 = vmax.f32 %v1985_v37, 0.0 }
 0x496   :  { %v2106_v20 = vmax.f32 %v1980_v0, 0.0 }
 0x497   :  { %v2139_v58 = vadd.f32 %v2107_v43, %v4993_v29 }
 0x498   :  { %v2138_v60 = vadd.f32 %v2106_v20, %v4989_v23 }
 0x49a   :  { %v3701_v49 = vpop.f32.mrb[122].mxu1  ;;  %3752 = vmatprep.mubr.msk.f32.mxu0 %vm676_vm0, %v2138_v60 }
 0x49b   :  { %v1995_v21 = vadd.f32 %v3701_v49, %v5217_v45  ;;  %v1989_v25 = vpop.f32.mrb[123].mxu1  ;;  %3753 = vmatmul.mubr.msk.f32.gmra.mrb[120].mxu0 %vm676_vm0, %v2139_v58 }
 0x49c   :  { %v1990_v26 = vadd.f32 %v1989_v25, %v5217_v45  ;;  %v2181_v25 = vld [vmem:[#allocation2 + $0x750] sm:$0xff] }
 0x49d   :  { %v2109_v33 = vmax.f32 %v1995_v21, 0.0  ;;  %v2180_v21 = vld [vmem:[#allocation2 + $0x6d8] sm:$0xff] }
 0x49e   :  { %v2108_v39 = vmax.f32 %v1990_v26, 0.0 }
 0x49f   :  { %v2141_v38 = vadd.f32 %v2109_v33, %v5007_v55  ;;  %v4080_v33 = vpack.c.bf16 %v2181_v25, %v2180_v21 }
 0x4a0   :  { %v2140_v34 = vadd.f32 %v2108_v39, %v5003_v40 }
 0x4a1   :  { %4081 = vmatprep.subr.bf16.mxu1 %v4080_v33 }
 0x4a2   :  { %v3704_v4 = vpop.f32.mrb[124].mxu1  ;;  %3755 = vmatprep.mubr.msk.f32.mxu0 %vm676_vm0, %v2140_v34  ;;  %4083 = vmatpush3.bf16.msra.mxu1 %v4080_v33 }
 0x4a3   :  { %v2005_v23 = vadd.f32 %v3704_v4, %v5217_v45  ;;  %v1999_v29 = vpop.f32.mrb[125].mxu1  ;;  %3756 = vmatmul.mubr.msk.f32.gmra.mrb[122].mxu0 %vm676_vm0, %v2141_v38 }
 0x4a4   :  { %v2000_v63 = vadd.f32 %v1999_v29, %v5217_v45 }
 0x4a5   :  { %v2111_v10 = vmax.f32 %v2005_v23, 0.0 }
 0x4a6   :  { %v2110_v48 = vmax.f32 %v2000_v63, 0.0 }
 0x4a7   :  { %v2143_v31 = vadd.f32 %v2111_v10, %v5021_v54 }
 0x4a8   :  { %v2142_v18 = vadd.f32 %v2110_v48, %v5017_v53 }
 0x4aa   :  { %v3707_v51 = vpop.f32.mrb[126].mxu1  ;;  %3758 = vmatprep.mubr.msk.f32.mxu0 %vm676_vm0, %v2142_v18 }
 0x4ab   :  { %v2015_v40 = vadd.f32 %v3707_v51, %v5217_v45  ;;  %v2009_v55 = vpop.f32.mrb[127].mxu1  ;;  %3759 = vmatmul.mubr.msk.f32.gmra.mrb[124].mxu0 %vm676_vm0, %v2143_v31 }
 0x4ac   :  { %v2010_v47 = vadd.f32 %v2009_v55, %v5217_v45 }
 0x4ad   :  { %v2113_v62 = vmax.f32 %v2015_v40, 0.0 }
 0x4ae   :  { %v2112_v44 = vmax.f32 %v2010_v47, 0.0 }
 0x4af   :  { %v2145_v2 = vadd.f32 %v2113_v62, %v5035_v5 }
 0x4b0   :  { %v2144_v27 = vadd.f32 %v2112_v44, %v5031_v59 }
 0x4b2   :  { %v3710_v11 = vpop.f32.mrb[128].mxu1  ;;  %3761 = vmatprep.mubr.msk.f32.mxu0 %vm676_vm0, %v2144_v27 }
 0x4b3   :  { %v2025_v53 = vadd.f32 %v3710_v11, %v5217_v45  ;;  %v2019_v54 = vpop.f32.mrb[129].mxu1  ;;  %3762 = vmatmul.mubr.msk.f32.gmra.mrb[126].mxu0 %vm676_vm0, %v2145_v2 }
 0x4b4   :  { %v2020_v19 = vadd.f32 %v2019_v54, %v5217_v45  ;;  %v5678_v54 = vld [vmem:[#allocation11_spill] sm:$0xff] }
 0x4b5   :  { %v2115_v1 = vmax.f32 %v2025_v53, 0.0 }
 0x4b6   :  { %v2114_v61 = vmax.f32 %v2020_v19, 0.0 }
 0x4b7   :  { %v2147_v30 = vadd.f32 %v2115_v1, %v5049_v8 }
 0x4b8   :  { %v2146_v28 = vadd.f32 %v2114_v61, %v5045_v7 }
 0x4ba   :  { %v3713_v42 = vpop.f32.mrb[130].mxu1  ;;  %3764 = vmatprep.mubr.msk.f32.mxu0 %vm676_vm0, %v2146_v28  ;;  %v5680_v28 = vld [vmem:[#allocation13_spill] sm:$0xff] }
 0x4bb   :  { %v2035_v59 = vadd.f32 %v3713_v42, %v5217_v45  ;;  %v2029_v5 = vpop.f32.mrb[131].mxu1  ;;  %3765 = vmatmul.mubr.msk.f32.gmra.mrb[128].mxu0 %vm676_vm0, %v2147_v30  ;;  %v2182_v42 = vld [vmem:[#allocation2 + $0x50] sm:$0xff] }
 0x4bc   :  { %v2030_v32 = vadd.f32 %v2029_v5, %v5217_v45  ;;  %v2185_v5 = vld [vmem:[#allocation2 + $0x1b8] sm:$0xff] }
 0x4bd   :  { %v2117_v22 = vmax.f32 %v2035_v59, 0.0  ;;  %v2184_v59 = vld [vmem:[#allocation2 + $0x140] sm:$0xff] }
 0x4be   :  { %v2116_v3 = vmax.f32 %v2030_v32, 0.0  ;;  %v4088_v32 = vpack.c.bf16 %v2185_v5, %v2184_v59 }
 0x4bf   :  { %v2149_v36 = vadd.f32 %v2117_v22, %v5063_v41  ;;  %v2186_v22 = vld [vmem:[#allocation2 + $0x230] sm:$0xff] }
 0x4c0   :  { %v2148_v16 = vadd.f32 %v2116_v3, %v5059_v15  ;;  %v2187_v3 = vld [vmem:[#allocation2 + $0x2a8] sm:$0xff] }
 0x4c2   :  { %v3716_v50 = vpop.f32.mrb[132].mxu1  ;;  %3767 = vmatprep.mubr.msk.f32.mxu0 %vm676_vm0, %v2148_v16  ;;  %v4092_v16 = vpack.c.bf16 %v2187_v3, %v2186_v22  ;;  %v5693_v22 = vld [vmem:[#allocation40_spill] sm:$0xff] }
 0x4c3   :  { %v2045_v7 = vadd.f32 %v3716_v50, %v5217_v45  ;;  %v2039_v8 = vpop.f32.mrb[133].mxu1  ;;  %3768 = vmatmul.mubr.msk.f32.gmra.mrb[130].mxu0 %vm676_vm0, %v2149_v36  ;;  %v2188_v36 = vld [vmem:[#allocation2 + $0x320] sm:$0xff]  ;;  %v2189_v50 = vld [vmem:[#allocation2 + $0x398] sm:$0xff] }
 0x4c4   :  { %v2040_v17 = vadd.f32 %v2039_v8, %v5217_v45  ;;  %v2190_v8 = vld [vmem:[#allocation2 + $0x410] sm:$0xff] }
 0x4c5   :  { %v2119_v12 = vmax.f32 %v2045_v7, 0.0  ;;  %v4096_v7 = vpack.c.bf16 %v2189_v50, %v2188_v36  ;;  %v5694_v36 = vld [vmem:[#allocation39_spill] sm:$0xff] }
 0x4c6   :  { %v2118_v37 = vmax.f32 %v2040_v17, 0.0  ;;  %v2191_v17 = vld [vmem:[#allocation2 + $0x488] sm:$0xff] }
 0x4c7   :  { %v2151_v0 = vadd.f32 %v2119_v12, %v5077_v14  ;;  %v4100_v12 = vpack.c.bf16 %v2191_v17, %v2190_v8 }
 0x4c8   :  { %v2150_v57 = vadd.f32 %v2118_v37, %v5073_v24  ;;  %v2192_v37 = vld [vmem:[#allocation2 + $0x500] sm:$0xff] }
 0x4ca   :  { %v3719_v43 = vpop.f32.mrb[134].mxu1  ;;  %3770 = vmatprep.mubr.msk.f32.mxu0 %vm676_vm0, %v2150_v57  ;;  %v2193_v57 = vld [vmem:[#allocation2 + $0x578] sm:$0xff] }
 0x4cb   :  { %v2055_v15 = vadd.f32 %v3719_v43, %v5217_v45  ;;  %v2049_v41 = vpop.f32.mrb[135].mxu1  ;;  %3771 = vmatmul.mubr.msk.f32.gmra.mrb[132].mxu0 %vm676_vm0, %v2151_v0  ;;  %v4104_v43 = vpack.c.bf16 %v2193_v57, %v2192_v37 }
 0x4cc   :  { %v2050_v20 = vadd.f32 %v2049_v41, %v5217_v45 }
 0x4cd   :  { %v2121_v60 = vmax.f32 %v2055_v15, 0.0  ;;  %v5681_v15 = vld [vmem:[#allocation20_spill] sm:$0xff] }
 0x4ce   :  { %v2120_v58 = vmax.f32 %v2050_v20, 0.0  ;;  %v3722_v49 = vpop.f32.mrb[136].mxu1 }
 0x4cf   :  { %v2065_v26 = vadd.f32 %v3722_v49, %v5217_v45  ;;  %v2059_v24 = vpop.f32.mrb[137].mxu1  ;;  %v2153_v34 = vadd.f32 %v2121_v60, %v5093_v52  ;;  %v2194_v60 = vld [vmem:[#allocation2 + $0x5f0] sm:$0xff]  ;;  %v5682_v49 = vld [vmem:[#allocation18_spill] sm:$0xff] }
 0x4d0   :  { %v2152_v14 = vadd.f32 %v2120_v58, %v5088_v35  ;;  %v2060_v39 = vadd.f32 %v2059_v24, %v5217_v45  ;;  %v2195_v58 = vld [vmem:[#allocation2 + $0x668] sm:$0xff] }
 0x4d1   :  { %v2123_v38 = vmax.f32 %v2065_v26, 0.0  ;;  %v4108_v26 = vpack.c.bf16 %v2195_v58, %v2194_v60  ;;  %v5697_v60 = vld [vmem:[#allocation44_spill] sm:$0xff] }
 0x4d2   :  { %v2122_v4 = vmax.f32 %v2060_v39, 0.0  ;;  %v3725_v23 = vpop.f32.mrb[138].mxu1  ;;  %3773 = vmatprep.mubr.msk.f32.mxu0 %vm676_vm0, %v2152_v14  ;;  %v5683_v14 = vld [vmem:[#allocation24_spill] sm:$0xff] }
 0x4d3   :  { %v2075_v29 = vadd.f32 %v3725_v23, %v5217_v45  ;;  %v2069_v63 = vpop.f32.mrb[139].mxu1  ;;  %3774 = vmatmul.mubr.msk.f32.gmra.mrb[134].mxu0 %vm676_vm0, %v2153_v34  ;;  %v2155_v48 = vadd.f32 %v2123_v38, %v5107_v6  ;;  %v5684_v38 = vld [vmem:[#allocation22_spill] sm:$0xff] }
 0x4d4   :  { %v2154_v10 = vadd.f32 %v2122_v4, %v5102_v46  ;;  %v2070_v35 = vadd.f32 %v2069_v63, %v5217_v45 }
 0x4d5   :  { %v2125_v18 = vmax.f32 %v2075_v29, 0.0 }
 0x4d6   :  { %v2124_v52 = vmax.f32 %v2070_v35, 0.0  ;;  %v3728_v31 = vpop.f32.mrb[140].mxu1  ;;  %3776 = vmatprep.mubr.msk.f32.mxu0 %vm676_vm0, %v2154_v10  ;;  %v5685_v10 = vld [vmem:[#allocation28_spill] sm:$0xff] }
 0x4d7   :  { %v2085_v51 = vadd.f32 %v3728_v31, %v5217_v45  ;;  %v2079_v40 = vpop.f32.mrb[141].mxu1  ;;  %3777 = vmatmul.mubr.msk.f32.gmra.mrb[136].mxu0 %vm676_vm0, %v2155_v48  ;;  %v2157_v46 = vadd.f32 %v2125_v18, %v5121_v9  ;;  %v5679_v9 = vld [vmem:[#allocation12_spill] sm:$0xff]  ;;  %v5686_v18 = vld [vmem:[#allocation26_spill] sm:$0xff] }
 0x4d8   :  { %v2156_v55 = vadd.f32 %v2124_v52, %v5116_v13  ;;  %v2080_v47 = vadd.f32 %v2079_v40, %v5217_v45 }
 0x4d9   :  { %v2127_v62 = vmax.f32 %v2085_v51, 0.0 }
 0x4da   :  { %v2126_v44 = vmax.f32 %v2080_v47, 0.0  ;;  %v3731_v27 = vpop.f32.mrb[142].mxu1  ;;  %3779 = vmatprep.mubr.msk.f32.mxu0 %vm676_vm0, %v2156_v55  ;;  %v5687_v55 = vld [vmem:[#allocation32_spill] sm:$0xff] }
 0x4db   :  { %v2095_v6 = vadd.f32 %v3731_v27, %v5217_v45  ;;  %v2089_v2 = vpop.f32.mrb[143].mxu1  ;;  %3780 = vmatmul.mubr.msk.f32.gmra.mrb[138].mxu0 %vm676_vm0, %v2157_v46  ;;  %v2159_v13 = vadd.f32 %v2127_v62, %v5678_v54  ;;  %v5688_v62 = vld [vmem:[#allocation30_spill] sm:$0xff] }
 0x4dc   :  { %v2158_v11 = vadd.f32 %v2126_v44, %v5130_v56  ;;  %v2090_v53 = vadd.f32 %v2089_v2, %v5217_v45  ;;  %v2183_v56 = vld [vmem:[#allocation2 + $0xc8] sm:$0xff] }
 0x4dd   :  { %v2129_v19 = vmax.f32 %v2095_v6, 0.0  ;;  %v4084_v45 = vpack.c.bf16 %v2183_v56, %v2182_v42  ;;  %v5692_v56 = vld [vmem:[#allocation36_spill] sm:$0xff] }
 0x4de   :  { %v2128_v1 = vmax.f32 %v2090_v53, 0.0  ;;  %3782 = vmatprep.mubr.msk.f32.mxu0 %vm676_vm0, %v2158_v11  ;;  %v5689_v11 = vld [vmem:[#allocation35_spill] sm:$0xff] }
 0x4df   :  { %3783 = vmatmul.mubr.msk.f32.gmra.mrb[140].mxu0 %vm676_vm0, %v2159_v13  ;;  %v2161_v30 = vadd.f32 %v2129_v19, %v5680_v28  ;;  %4085 = vmatprep.subr.bf16.mxu0 %v4084_v45  ;;  %v5690_v13 = vld [vmem:[#allocation34_spill] sm:$0xff]  ;;  %v5691_v28 = vld [vmem:[#allocation37_spill] sm:$0xff] }
 0x4e0   :  { %v2160_v61 = vadd.f32 %v2128_v1, %v5679_v9  ;;  %4087 = vmatpush3.bf16.msra.mxu0 %v4084_v45 }
 0x4e1   :  { %4089 = vmatprep.subr.bf16.mxu0 %v4088_v32 }
 0x4e2   :  { %3785 = vmatprep.mubr.msk.f32.mxu0 %vm676_vm0, %v2160_v61 }
 0x4e3   :  { %3786 = vmatmul.mubr.msk.f32.gmra.mrb[142].mxu0 %vm676_vm0, %v2161_v30 }
 0x4e4   :  { %4091 = vmatpush3.bf16.msra.mxu0 %v4088_v32 }
 0x4e5   :  { %4093 = vmatprep.subr.bf16.mxu0 %v4092_v16 }
 0x4e8   :  { %4095 = vmatpush3.bf16.msra.mxu0 %v4092_v16 }
 0x4e9   :  { %4097 = vmatprep.subr.bf16.mxu0 %v4096_v7 }
 0x4ec   :  { %4099 = vmatpush3.bf16.msra.mxu0 %v4096_v7 }
 0x4ed   :  { %4101 = vmatprep.subr.bf16.mxu0 %v4100_v12 }
 0x4f0   :  { %4103 = vmatpush3.bf16.msra.mxu0 %v4100_v12  ;;  %v5695_v12 = vld [vmem:[#allocation42_spill] sm:$0xff] }
 0x4f1   :  { %4105 = vmatprep.subr.bf16.mxu0 %v4104_v43 }
 0x4f4   :  { %4107 = vmatpush3.bf16.msra.mxu0 %v4104_v43 }
 0x4f5   :  { %4109 = vmatprep.subr.bf16.mxu0 %v4108_v26 }
 0x4f8   :  { %4111 = vmatpush3.bf16.msra.mxu0 %v4108_v26 }
 0x54e   :  { %v3742_v0 = vpop.f32.mrb[112].mxu0 }
 0x54f   :  { %v2368_v41 = vadd.f32 %v3742_v0, %v5681_v15  ;;  %v2362_v20 = vpop.f32.mrb[113].mxu0  ;;  %v5696_v0 = vld [vmem:[#allocation41_spill] sm:$0xff] }
 0x550   :  { %v2363_v21 = vadd.f32 %v2362_v20, %v5682_v49 }
 0x551   :  { %v2522_v24 = vmax.f32 %v2368_v41, 0.0 }
 0x552   :  { %v2521_v25 = vmax.f32 %v2363_v21, 0.0  ;;  %v5698_v21 = vld [vmem:[#allocation43_spill] sm:$0xff] }
 0x554   :  { %3820 = vmatprep.mubr.f32.mxu1 %v2521_v25 }
 0x555   :  { %3821 = vmatmul.mubr.f32.vlgmr.msra.gmra.mrb[144].mxu1 %v2522_v24 }
 0x556   :  { %v3745_v33 = vpop.f32.mrb[114].mxu0 }
 0x557   :  { %v2378_v39 = vadd.f32 %v3745_v33, %v5683_v14  ;;  %v2372_v34 = vpop.f32.mrb[115].mxu0  ;;  %v5699_v14 = vld [vmem:[#allocation46_spill] sm:$0xff] }
 0x558   :  { %v2373_v4 = vadd.f32 %v2372_v34, %v5684_v38  ;;  %v5700_v38 = vld [vmem:[#allocation45_spill] sm:$0xff] }
 0x559   :  { %v2524_v29 = vmax.f32 %v2378_v39, 0.0 }
 0x55a   :  { %v2523_v23 = vmax.f32 %v2373_v4, 0.0 }
 0x55c   :  { %3823 = vmatprep.mubr.f32.mxu1 %v2523_v23 }
 0x55d   :  { %3824 = vmatmul.mubr.f32.gmra.mrb[146].mxu1 %v2524_v29 }
 0x55e   :  { %v3748_v63 = vpop.f32.mrb[116].mxu0 }
 0x55f   :  { %v2388_v35 = vadd.f32 %v3748_v63, %v5685_v10  ;;  %v2382_v48 = vpop.f32.mrb[117].mxu0  ;;  %v5701_v10 = vld [vmem:[#allocation48_spill] sm:$0xff] }
 0x560   :  { %v2383_v52 = vadd.f32 %v2382_v48, %v5686_v18  ;;  %v5702_v18 = vld [vmem:[#allocation47_spill] sm:$0xff] }
 0x561   :  { %v2526_v51 = vmax.f32 %v2388_v35, 0.0 }
 0x562   :  { %v2525_v31 = vmax.f32 %v2383_v52, 0.0 }
 0x564   :  { %3826 = vmatprep.mubr.f32.mxu1 %v2525_v31 }
 0x565   :  { %3827 = vmatmul.mubr.f32.gmra.mrb[148].mxu1 %v2526_v51 }
 0x566   :  { %v3751_v40 = vpop.f32.mrb[118].mxu0 }
 0x567   :  { %v2398_v47 = vadd.f32 %v3751_v40, %v5687_v55  ;;  %v2392_v46 = vpop.f32.mrb[119].mxu0  ;;  %v5703_v55 = vld [vmem:[#allocation50_spill] sm:$0xff] }
 0x568   :  { %v2393_v44 = vadd.f32 %v2392_v46, %v5688_v62  ;;  %v5704_v62 = vld [vmem:[#allocation49_spill] sm:$0xff] }
 0x569   :  { %v2528_v6 = vmax.f32 %v2398_v47, 0.0 }
 0x56a   :  { %v2527_v27 = vmax.f32 %v2393_v44, 0.0 }
 0x56c   :  { %3829 = vmatprep.mubr.f32.mxu1 %v2527_v27  ;;  %v2196_v27 = vld [vmem:[#allocation2 + $0x6e0] sm:$0xff] }
 0x56d   :  { %3830 = vmatmul.mubr.f32.gmra.mrb[150].mxu1 %v2528_v6  ;;  %v2197_v6 = vld [vmem:[#allocation2 + $0x758] sm:$0xff] }
 0x56e   :  { %v3754_v2 = vpop.f32.mrb[120].mxu0 }
 0x56f   :  { %v2408_v53 = vadd.f32 %v3754_v2, %v5689_v11  ;;  %v2402_v54 = vpop.f32.mrb[121].mxu0  ;;  %v4112_v2 = vpack.c.bf16 %v2197_v6, %v2196_v27 }
 0x570   :  { %v2403_v19 = vadd.f32 %v2402_v54, %v5690_v13  ;;  %v5705_v13 = vld [vmem:[#allocation52_spill] sm:$0xff] }
 0x571   :  { %v2530_v9 = vmax.f32 %v2408_v53, 0.0  ;;  %4113 = vmatprep.subr.bf16.mxu0 %v4112_v2 }
 0x572   :  { %v2529_v1 = vmax.f32 %v2403_v19, 0.0  ;;  %4115 = vmatpush3.bf16.msra.mxu0 %v4112_v2 }
 0x574   :  { %3832 = vmatprep.mubr.f32.mxu1 %v2529_v1 }
 0x575   :  { %3833 = vmatmul.mubr.f32.gmra.mrb[152].mxu1 %v2530_v9  ;;  %v5706_v9 = vld [vmem:[#allocation51_spill] sm:$0xff] }
 0x576   :  { %v3757_v61 = vpop.f32.mrb[122].mxu0 }
 0x577   :  { %v2418_v30 = vadd.f32 %v3757_v61, %v5691_v28  ;;  %v2412_v42 = vpop.f32.mrb[123].mxu0 }
 0x578   :  { %v2413_v59 = vadd.f32 %v2412_v42, %v5692_v56  ;;  %v5707_v56 = vld [vmem:[#allocation54_spill] sm:$0xff] }
 0x579   :  { %v2532_v5 = vmax.f32 %v2418_v30, 0.0 }
 0x57a   :  { %v2531_v45 = vmax.f32 %v2413_v59, 0.0 }
 0x57c   :  { %3835 = vmatprep.mubr.f32.mxu1 %v2531_v45 }
 0x57d   :  { %3836 = vmatmul.mubr.f32.gmra.mrb[154].mxu1 %v2532_v5  ;;  %v5708_v5 = vld [vmem:[#allocation53_spill] sm:$0xff] }
 0x57e   :  { %v3760_v32 = vpop.f32.mrb[124].mxu0 }
 0x57f   :  { %v2428_v3 = vadd.f32 %v3760_v32, %v5693_v22  ;;  %v2422_v16 = vpop.f32.mrb[125].mxu0 }
 0x580   :  { %v2423_v50 = vadd.f32 %v2422_v16, %v5694_v36  ;;  %v5709_v36 = vld [vmem:[#allocation57_spill] sm:$0xff] }
 0x581   :  { %v2534_v8 = vmax.f32 %v2428_v3, 0.0 }
 0x582   :  { %v2533_v7 = vmax.f32 %v2423_v50, 0.0 }
 0x584   :  { %3838 = vmatprep.mubr.f32.mxu1 %v2533_v7 }
 0x585   :  { %3839 = vmatmul.mubr.f32.gmra.mrb[156].mxu1 %v2534_v8  ;;  %v5710_v8 = vld [vmem:[#allocation56_spill] sm:$0xff] }
 0x586   :  { %v3763_v17 = vpop.f32.mrb[126].mxu0 }
 0x587   :  { %v2438_v37 = vadd.f32 %v3763_v17, %v5695_v12  ;;  %v2432_v57 = vpop.f32.mrb[127].mxu0 }
 0x588   :  { %v2433_v43 = vadd.f32 %v2432_v57, %v5696_v0  ;;  %v5711_v0 = vld [vmem:[#allocation61_spill] sm:$0xff] }
 0x589   :  { %v2536_v41 = vmax.f32 %v2438_v37, 0.0 }
 0x58a   :  { %v2535_v15 = vmax.f32 %v2433_v43, 0.0 }
 0x58c   :  { %3841 = vmatprep.mubr.f32.mxu1 %v2535_v15 }
 0x58d   :  { %3842 = vmatmul.mubr.f32.gmra.mrb[158].mxu1 %v2536_v41  ;;  %v5712_v41 = vld [vmem:[#allocation59_spill] sm:$0xff] }
 0x58e   :  { %v3766_v20 = vpop.f32.mrb[128].mxu0 }
 0x58f   :  { %v2448_v58 = vadd.f32 %v3766_v20, %v5697_v60  ;;  %v2442_v49 = vpop.f32.mrb[129].mxu0 }
 0x590   :  { %v2443_v25 = vadd.f32 %v2442_v49, %v5698_v21  ;;  %v5347_v49 = vld [vmem:[#allocation2 + $0x68] ss:$0 sm:$0xff] }
 0x591   :  { %v2538_v24 = vmax.f32 %v2448_v58, 0.0 }
 0x592   :  { %v2537_v26 = vmax.f32 %v2443_v25, 0.0 }
 0x594   :  { %3844 = vmatprep.mubr.f32.mxu1 %v2537_v26 }
 0x595   :  { %3845 = vmatmul.mubr.f32.gmra.mrb[160].mxu1 %v2538_v24 }
 0x596   :  { %v3769_v33 = vpop.f32.mrb[130].mxu0 }
 0x597   :  { %v2458_v39 = vadd.f32 %v3769_v33, %v5699_v14  ;;  %v2452_v34 = vpop.f32.mrb[131].mxu0 }
 0x598   :  { %v2453_v4 = vadd.f32 %v2452_v34, %v5700_v38 }
 0x599   :  { %v2540_v29 = vmax.f32 %v2458_v39, 0.0 }
 0x59a   :  { %v2539_v23 = vmax.f32 %v2453_v4, 0.0 }
 0x59c   :  { %3847 = vmatprep.mubr.f32.mxu1 %v2539_v23 }
 0x59d   :  { %3848 = vmatmul.mubr.f32.gmra.mrb[162].mxu1 %v2540_v29 }
 0x59e   :  { %v3772_v63 = vpop.f32.mrb[132].mxu0 }
 0x59f   :  { %v2468_v35 = vadd.f32 %v3772_v63, %v5701_v10  ;;  %v2462_v48 = vpop.f32.mrb[133].mxu0 }
 0x5a0   :  { %v2463_v52 = vadd.f32 %v2462_v48, %v5702_v18 }
 0x5a1   :  { %v2542_v51 = vmax.f32 %v2468_v35, 0.0 }
 0x5a2   :  { %v2541_v31 = vmax.f32 %v2463_v52, 0.0 }
 0x5a4   :  { %3850 = vmatprep.mubr.f32.mxu1 %v2541_v31 }
 0x5a5   :  { %3851 = vmatmul.mubr.f32.gmra.mrb[164].mxu1 %v2542_v51 }
 0x5a6   :  { %v3775_v40 = vpop.f32.mrb[134].mxu0 }
 0x5a7   :  { %v2478_v47 = vadd.f32 %v3775_v40, %v5703_v55  ;;  %v2472_v46 = vpop.f32.mrb[135].mxu0 }
 0x5a8   :  { %v2473_v44 = vadd.f32 %v2472_v46, %v5704_v62 }
 0x5a9   :  { %v2544_v54 = vmax.f32 %v2478_v47, 0.0 }
 0x5aa   :  { %v2543_v11 = vmax.f32 %v2473_v44, 0.0  ;;  %v3778_v53 = vpop.f32.mrb[136].mxu0 }
 0x5ab   :  { %v2488_v19 = vadd.f32 %v3778_v53, %v5705_v13  ;;  %v2482_v1 = vpop.f32.mrb[137].mxu0 }
 0x5ac   :  { %v2483_v61 = vadd.f32 %v2482_v1, %v5706_v9  ;;  %3853 = vmatprep.mubr.f32.mxu1 %v2543_v11 }
 0x5ad   :  { %3854 = vmatmul.mubr.f32.gmra.mrb[166].mxu1 %v2544_v54  ;;  %v2546_v42 = vmax.f32 %v2488_v19, 0.0 }
 0x5ae   :  { %v2545_v28 = vmax.f32 %v2483_v61, 0.0  ;;  %v3781_v30 = vpop.f32.mrb[138].mxu0 }
 0x5af   :  { %v2498_v59 = vadd.f32 %v3781_v30, %v5707_v56  ;;  %v2492_v45 = vpop.f32.mrb[139].mxu0 }
 0x5b0   :  { %v2493_v32 = vadd.f32 %v2492_v45, %v5708_v5  ;;  %3856 = vmatprep.mubr.f32.mxu1 %v2545_v28 }
 0x5b1   :  { %3857 = vmatmul.mubr.f32.gmra.mrb[168].mxu1 %v2546_v42  ;;  %v2548_v16 = vmax.f32 %v2498_v59, 0.0 }
 0x5b2   :  { %v2547_v22 = vmax.f32 %v2493_v32, 0.0  ;;  %v3784_v3 = vpop.f32.mrb[140].mxu0 }
 0x5b3   :  { %v2508_v50 = vadd.f32 %v3784_v3, %v5709_v36  ;;  %v2502_v7 = vpop.f32.mrb[141].mxu0 }
 0x5b4   :  { %v2503_v17 = vadd.f32 %v2502_v7, %v5710_v8  ;;  %3859 = vmatprep.mubr.f32.mxu1 %v2547_v22 }
 0x5b5   :  { %3860 = vmatmul.mubr.f32.gmra.mrb[170].mxu1 %v2548_v16  ;;  %v2550_v57 = vmax.f32 %v2508_v50, 0.0 }
 0x5b6   :  { %v2549_v12 = vmax.f32 %v2503_v17, 0.0  ;;  %v3787_v37 = vpop.f32.mrb[142].mxu0 }
 0x5b7   :  { %v2518_v43 = vadd.f32 %v3787_v37, %v5711_v0  ;;  %v2512_v15 = vpop.f32.mrb[143].mxu0 }
 0x5b8   :  { %v2513_v20 = vadd.f32 %v2512_v15, %v5712_v41  ;;  %3862 = vmatprep.mubr.f32.mxu1 %v2549_v12 }
 0x5b9   :  { %3863 = vmatmul.mubr.f32.gmra.mrb[172].mxu1 %v2550_v57  ;;  %v2552_v58 = vmax.f32 %v2518_v43, 0.0 }
 0x5ba   :  { %v2551_v60 = vmax.f32 %v2513_v20, 0.0 }
 0x5bc   :  { %3865 = vmatprep.mubr.f32.mxu1 %v2551_v60 }
 0x5bd   :  { %3866 = vmatmul.mubr.f32.gmra.mrb[174].mxu1 %v2552_v58 }
 0x628   :  { %v3822_v21 = vpop.f32.mrb[144].mxu1 }
 0x629   :  { %v2625_v25 = vadd.f32 %v3822_v21, %v5347_v49  ;;  %v2619_v26 = vpop.f32.mrb[145].mxu1 }
 0x62a   :  { %v2620_v24 = vadd.f32 %v2619_v26, %v5347_v49 }
 0x62b   :  { %v2779_v14 = vmax.f32 %v2625_v25, 0.0 }
 0x62c   :  { %v2778_v33 = vmax.f32 %v2620_v24, 0.0 }
 0x62e   :  { %3900 = vmatprep.mubr.f32.mxu0 %v2778_v33 }
 0x62f   :  { %3901 = vmatmul.mubr.f32.vlgmr.msra.gmra.mrb[144].mxu0 %v2779_v14 }
 0x630   :  { %v3825_v39 = vpop.f32.mrb[146].mxu1 }
 0x631   :  { %v2635_v34 = vadd.f32 %v3825_v39, %v5347_v49  ;;  %v2629_v38 = vpop.f32.mrb[147].mxu1 }
 0x632   :  { %v2630_v4 = vadd.f32 %v2629_v38, %v5347_v49 }
 0x633   :  { %v2781_v29 = vmax.f32 %v2635_v34, 0.0 }
 0x634   :  { %v2780_v23 = vmax.f32 %v2630_v4, 0.0 }
 0x636   :  { %3903 = vmatprep.mubr.f32.mxu0 %v2780_v23 }
 0x637   :  { %3904 = vmatmul.mubr.f32.gmra.mrb[146].mxu0 %v2781_v29 }
 0x638   :  { %v3828_v63 = vpop.f32.mrb[148].mxu1 }
 0x639   :  { %v2645_v10 = vadd.f32 %v3828_v63, %v5347_v49  ;;  %v2639_v35 = vpop.f32.mrb[149].mxu1 }
 0x63a   :  { %v2640_v48 = vadd.f32 %v2639_v35, %v5347_v49 }
 0x63b   :  { %v2783_v52 = vmax.f32 %v2645_v10, 0.0 }
 0x63c   :  { %v2782_v18 = vmax.f32 %v2640_v48, 0.0 }
 0x63e   :  { %3906 = vmatprep.mubr.f32.mxu0 %v2782_v18 }
 0x63f   :  { %3907 = vmatmul.mubr.f32.gmra.mrb[148].mxu0 %v2783_v52 }
 0x640   :  { %v3831_v31 = vpop.f32.mrb[150].mxu1 }
 0x641   :  { %v2655_v51 = vadd.f32 %v3831_v31, %v5347_v49  ;;  %v2649_v40 = vpop.f32.mrb[151].mxu1 }
 0x642   :  { %v2650_v55 = vadd.f32 %v2649_v40, %v5347_v49 }
 0x643   :  { %v2785_v46 = vmax.f32 %v2655_v51, 0.0 }
 0x644   :  { %v2784_v47 = vmax.f32 %v2650_v55, 0.0 }
 0x646   :  { %3909 = vmatprep.mubr.f32.mxu0 %v2784_v47 }
 0x647   :  { %3910 = vmatmul.mubr.f32.gmra.mrb[150].mxu0 %v2785_v46 }
 0x648   :  { %v3834_v62 = vpop.f32.mrb[152].mxu1 }
 0x649   :  { %v2665_v44 = vadd.f32 %v3834_v62, %v5347_v49  ;;  %v2659_v27 = vpop.f32.mrb[153].mxu1 }
 0x64a   :  { %v2660_v6 = vadd.f32 %v2659_v27, %v5347_v49 }
 0x64b   :  { %v2787_v11 = vmax.f32 %v2665_v44, 0.0 }
 0x64c   :  { %v2786_v2 = vmax.f32 %v2660_v6, 0.0 }
 0x64e   :  { %3912 = vmatprep.mubr.f32.mxu0 %v2786_v2 }
 0x64f   :  { %3913 = vmatmul.mubr.f32.gmra.mrb[152].mxu0 %v2787_v11 }
 0x650   :  { %v3837_v53 = vpop.f32.mrb[154].mxu1 }
 0x651   :  { %v2675_v54 = vadd.f32 %v3837_v53, %v5347_v49  ;;  %v2669_v13 = vpop.f32.mrb[155].mxu1 }
 0x652   :  { %v2670_v19 = vadd.f32 %v2669_v13, %v5347_v49 }
 0x653   :  { %v2789_v9 = vmax.f32 %v2675_v54, 0.0 }
 0x654   :  { %v2788_v1 = vmax.f32 %v2670_v19, 0.0  ;;  %v5381_v19 = vld [vmem:[#allocation2 + $0x70] ss:$0 sm:$0xff] }
 0x656   :  { %3915 = vmatprep.mubr.f32.mxu0 %v2788_v1 }
 0x657   :  { %3916 = vmatmul.mubr.f32.gmra.mrb[154].mxu0 %v2789_v9 }
 0x658   :  { %v3840_v61 = vpop.f32.mrb[156].mxu1 }
 0x659   :  { %v2685_v28 = vadd.f32 %v3840_v61, %v5347_v49  ;;  %v2679_v30 = vpop.f32.mrb[157].mxu1 }
 0x65a   :  { %v2680_v42 = vadd.f32 %v2679_v30, %v5347_v49 }
 0x65b   :  { %v2791_v59 = vmax.f32 %v2685_v28, 0.0 }
 0x65c   :  { %v2790_v56 = vmax.f32 %v2680_v42, 0.0 }
 0x65e   :  { %3918 = vmatprep.mubr.f32.mxu0 %v2790_v56 }
 0x65f   :  { %3919 = vmatmul.mubr.f32.gmra.mrb[156].mxu0 %v2791_v59 }
 0x660   :  { %v3843_v45 = vpop.f32.mrb[158].mxu1 }
 0x661   :  { %v2695_v5 = vadd.f32 %v3843_v45, %v5347_v49  ;;  %v2689_v32 = vpop.f32.mrb[159].mxu1 }
 0x662   :  { %v2690_v22 = vadd.f32 %v2689_v32, %v5347_v49 }
 0x663   :  { %v2793_v16 = vmax.f32 %v2695_v5, 0.0 }
 0x664   :  { %v2792_v3 = vmax.f32 %v2690_v22, 0.0 }
 0x666   :  { %3921 = vmatprep.mubr.f32.mxu0 %v2792_v3 }
 0x667   :  { %3922 = vmatmul.mubr.f32.gmra.mrb[158].mxu0 %v2793_v16 }
 0x668   :  { %v3846_v36 = vpop.f32.mrb[160].mxu1 }
 0x669   :  { %v2705_v50 = vadd.f32 %v3846_v36, %v5347_v49  ;;  %v2699_v7 = vpop.f32.mrb[161].mxu1 }
 0x66a   :  { %v2700_v8 = vadd.f32 %v2699_v7, %v5347_v49 }
 0x66b   :  { %v2795_v12 = vmax.f32 %v2705_v50, 0.0 }
 0x66c   :  { %v2794_v17 = vmax.f32 %v2700_v8, 0.0 }
 0x66e   :  { %3924 = vmatprep.mubr.f32.mxu0 %v2794_v17 }
 0x66f   :  { %3925 = vmatmul.mubr.f32.gmra.mrb[160].mxu0 %v2795_v12 }
 0x670   :  { %v3849_v37 = vpop.f32.mrb[162].mxu1 }
 0x671   :  { %v2715_v57 = vadd.f32 %v3849_v37, %v5347_v49  ;;  %v2709_v0 = vpop.f32.mrb[163].mxu1 }
 0x672   :  { %v2710_v43 = vadd.f32 %v2709_v0, %v5347_v49 }
 0x673   :  { %v2797_v41 = vmax.f32 %v2715_v57, 0.0 }
 0x674   :  { %v2796_v15 = vmax.f32 %v2710_v43, 0.0 }
 0x676   :  { %3927 = vmatprep.mubr.f32.mxu0 %v2796_v15 }
 0x677   :  { %3928 = vmatmul.mubr.f32.gmra.mrb[162].mxu0 %v2797_v41 }
 0x678   :  { %v3852_v20 = vpop.f32.mrb[164].mxu1 }
 0x679   :  { %v2725_v60 = vadd.f32 %v3852_v20, %v5347_v49  ;;  %v2719_v58 = vpop.f32.mrb[165].mxu1 }
 0x67a   :  { %v2720_v21 = vadd.f32 %v2719_v58, %v5347_v49 }
 0x67b   :  { %v2799_v26 = vmax.f32 %v2725_v60, 0.0 }
 0x67c   :  { %v2798_v25 = vmax.f32 %v2720_v21, 0.0 }
 0x67e   :  { %3930 = vmatprep.mubr.f32.mxu0 %v2798_v25 }
 0x67f   :  { %3931 = vmatmul.mubr.f32.gmra.mrb[164].mxu0 %v2799_v26 }
 0x680   :  { %v3855_v24 = vpop.f32.mrb[166].mxu1 }
 0x681   :  { %v2735_v33 = vadd.f32 %v3855_v24, %v5347_v49  ;;  %v2729_v14 = vpop.f32.mrb[167].mxu1 }
 0x682   :  { %v2730_v39 = vadd.f32 %v2729_v14, %v5347_v49 }
 0x683   :  { %v2801_v4 = vmax.f32 %v2735_v33, 0.0 }
 0x684   :  { %v2800_v34 = vmax.f32 %v2730_v39, 0.0  ;;  %v3858_v38 = vpop.f32.mrb[168].mxu1 }
 0x685   :  { %v2745_v23 = vadd.f32 %v3858_v38, %v5347_v49  ;;  %v2739_v29 = vpop.f32.mrb[169].mxu1 }
 0x686   :  { %v2740_v63 = vadd.f32 %v2739_v29, %v5347_v49  ;;  %3933 = vmatprep.mubr.f32.mxu0 %v2800_v34 }
 0x687   :  { %3934 = vmatmul.mubr.f32.gmra.mrb[166].mxu0 %v2801_v4  ;;  %v2803_v48 = vmax.f32 %v2745_v23, 0.0 }
 0x688   :  { %v2802_v10 = vmax.f32 %v2740_v63, 0.0  ;;  %v3861_v35 = vpop.f32.mrb[170].mxu1 }
 0x689   :  { %v2755_v18 = vadd.f32 %v3861_v35, %v5347_v49  ;;  %v2749_v52 = vpop.f32.mrb[171].mxu1 }
 0x68a   :  { %v2750_v31 = vadd.f32 %v2749_v52, %v5347_v49  ;;  %3936 = vmatprep.mubr.f32.mxu0 %v2802_v10 }
 0x68b   :  { %3937 = vmatmul.mubr.f32.gmra.mrb[168].mxu0 %v2803_v48  ;;  %v2805_v55 = vmax.f32 %v2755_v18, 0.0 }
 0x68c   :  { %v2804_v51 = vmax.f32 %v2750_v31, 0.0  ;;  %v3864_v40 = vpop.f32.mrb[172].mxu1 }
 0x68d   :  { %v2765_v47 = vadd.f32 %v3864_v40, %v5347_v49  ;;  %v2759_v46 = vpop.f32.mrb[173].mxu1 }
 0x68e   :  { %v2760_v62 = vadd.f32 %v2759_v46, %v5347_v49  ;;  %3939 = vmatprep.mubr.f32.mxu0 %v2804_v51 }
 0x68f   :  { %3940 = vmatmul.mubr.f32.gmra.mrb[170].mxu0 %v2805_v55  ;;  %v2807_v6 = vmax.f32 %v2765_v47, 0.0 }
 0x690   :  { %v2806_v44 = vmax.f32 %v2760_v62, 0.0  ;;  %v3867_v27 = vpop.f32.mrb[174].mxu1 }
 0x691   :  { %v2775_v2 = vadd.f32 %v3867_v27, %v5347_v49  ;;  %v2769_v11 = vpop.f32.mrb[175].mxu1 }
 0x692   :  { %v2770_v53 = vadd.f32 %v2769_v11, %v5347_v49  ;;  %3942 = vmatprep.mubr.f32.mxu0 %v2806_v44 }
 0x693   :  { %3943 = vmatmul.mubr.f32.gmra.mrb[172].mxu0 %v2807_v6  ;;  %v2809_v13 = vmax.f32 %v2775_v2, 0.0 }
 0x694   :  { %v2808_v54 = vmax.f32 %v2770_v53, 0.0 }
 0x696   :  { %3945 = vmatprep.mubr.f32.mxu0 %v2808_v54 }
 0x697   :  { %3946 = vmatmul.mubr.f32.gmra.mrb[174].mxu0 %v2809_v13 }
 0x702   :  { %v3902_v1 = vpop.f32.mrb[144].mxu0 }
 0x703   :  { %v2882_v9 = vadd.f32 %v3902_v1, %v5381_v19  ;;  %v2876_v61 = vpop.f32.mrb[145].mxu0 }
 0x704   :  { %v2877_v28 = vadd.f32 %v2876_v61, %v5381_v19 }
 0x705   :  { %3036 = vst [vmem:[%s5513_s2 + $0x8] sm:$0xff] %v2882_v9 }
 0x706   :  { %3035 = vst [vmem:[%s5513_s2] sm:$0xff] %v2877_v28 }
 0x70a   :  { %v3905_v49 = vpop.f32.mrb[146].mxu0 }
 0x70b   :  { %v2892_v30 = vadd.f32 %v3905_v49, %v5381_v19  ;;  %v2886_v42 = vpop.f32.mrb[147].mxu0 }
 0x70c   :  { %v2887_v56 = vadd.f32 %v2886_v42, %v5381_v19 }
 0x70d   :  { %3038 = vst [vmem:[%s5513_s2 + $0x18] sm:$0xff] %v2892_v30 }
 0x70e   :  { %3037 = vst [vmem:[%s5513_s2 + $0x10] sm:$0xff] %v2887_v56 }
 0x712   :  { %v3908_v59 = vpop.f32.mrb[148].mxu0 }
 0x713   :  { %v2902_v45 = vadd.f32 %v3908_v59, %v5381_v19  ;;  %v2896_v5 = vpop.f32.mrb[149].mxu0 }
 0x714   :  { %v2897_v32 = vadd.f32 %v2896_v5, %v5381_v19 }
 0x715   :  { %3040 = vst [vmem:[%s5513_s2 + $0x28] sm:$0xff] %v2902_v45 }
 0x716   :  { %3039 = vst [vmem:[%s5513_s2 + $0x20] sm:$0xff] %v2897_v32 }
 0x71a   :  { %v3911_v22 = vpop.f32.mrb[150].mxu0 }
 0x71b   :  { %v2912_v3 = vadd.f32 %v3911_v22, %v5381_v19  ;;  %v2906_v16 = vpop.f32.mrb[151].mxu0 }
 0x71c   :  { %v2907_v36 = vadd.f32 %v2906_v16, %v5381_v19 }
 0x71d   :  { %3042 = vst [vmem:[%s5513_s2 + $0x38] sm:$0xff] %v2912_v3 }
 0x71e   :  { %3041 = vst [vmem:[%s5513_s2 + $0x30] sm:$0xff] %v2907_v36 }
 0x722   :  { %v3914_v50 = vpop.f32.mrb[152].mxu0 }
 0x723   :  { %v2922_v7 = vadd.f32 %v3914_v50, %v5381_v19  ;;  %v2916_v8 = vpop.f32.mrb[153].mxu0 }
 0x724   :  { %v2917_v17 = vadd.f32 %v2916_v8, %v5381_v19 }
 0x725   :  { %3044 = vst [vmem:[%s5513_s2 + $0x48] sm:$0xff] %v2922_v7 }
 0x726   :  { %3043 = vst [vmem:[%s5513_s2 + $0x40] sm:$0xff] %v2917_v17 }
 0x72a   :  { %v3917_v12 = vpop.f32.mrb[154].mxu0 }
 0x72b   :  { %v2932_v37 = vadd.f32 %v3917_v12, %v5381_v19  ;;  %v2926_v57 = vpop.f32.mrb[155].mxu0 }
 0x72c   :  { %v2927_v0 = vadd.f32 %v2926_v57, %v5381_v19 }
 0x72d   :  { %3046 = vst [vmem:[%s5513_s2 + $0x58] sm:$0xff] %v2932_v37 }
 0x72e   :  { %3045 = vst [vmem:[%s5513_s2 + $0x50] sm:$0xff] %v2927_v0 }
 0x732   :  { %v3920_v43 = vpop.f32.mrb[156].mxu0 }
 0x733   :  { %v2942_v15 = vadd.f32 %v3920_v43, %v5381_v19  ;;  %v2936_v41 = vpop.f32.mrb[157].mxu0 }
 0x734   :  { %v2937_v20 = vadd.f32 %v2936_v41, %v5381_v19 }
 0x735   :  { %3048 = vst [vmem:[%s5513_s2 + $0x68] sm:$0xff] %v2942_v15 }
 0x736   :  { %3047 = vst [vmem:[%s5513_s2 + $0x60] sm:$0xff] %v2937_v20 }
 0x73a   :  { %v3923_v60 = vpop.f32.mrb[158].mxu0 }
 0x73b   :  { %v2952_v58 = vadd.f32 %v3923_v60, %v5381_v19  ;;  %v2946_v21 = vpop.f32.mrb[159].mxu0 }
 0x73c   :  { %v2947_v25 = vadd.f32 %v2946_v21, %v5381_v19 }
 0x73d   :  { %3050 = vst [vmem:[%s5513_s2 + $0x78] sm:$0xff] %v2952_v58 }
 0x73e   :  { %3049 = vst [vmem:[%s5513_s2 + $0x70] sm:$0xff] %v2947_v25 }
 0x742   :  { %v3926_v26 = vpop.f32.mrb[160].mxu0 }
 0x743   :  { %v2962_v24 = vadd.f32 %v3926_v26, %v5381_v19  ;;  %v2956_v33 = vpop.f32.mrb[161].mxu0 }
 0x744   :  { %v2957_v14 = vadd.f32 %v2956_v33, %v5381_v19 }
 0x745   :  { %3052 = vst [vmem:[%s5513_s2 + $0x88] sm:$0xff] %v2962_v24 }
 0x746   :  { %3051 = vst [vmem:[%s5513_s2 + $0x80] sm:$0xff] %v2957_v14 }
 0x74a   :  { %v3929_v39 = vpop.f32.mrb[162].mxu0 }
 0x74b   :  { %v2972_v34 = vadd.f32 %v3929_v39, %v5381_v19  ;;  %v2966_v38 = vpop.f32.mrb[163].mxu0 }
 0x74c   :  { %v2967_v4 = vadd.f32 %v2966_v38, %v5381_v19 }
 0x74d   :  { %3054 = vst [vmem:[%s5513_s2 + $0x98] sm:$0xff] %v2972_v34 }
 0x74e   :  { %3053 = vst [vmem:[%s5513_s2 + $0x90] sm:$0xff] %v2967_v4 }
 0x752   :  { %v3932_v23 = vpop.f32.mrb[164].mxu0 }
 0x753   :  { %v2982_v29 = vadd.f32 %v3932_v23, %v5381_v19  ;;  %v2976_v63 = vpop.f32.mrb[165].mxu0 }
 0x754   :  { %v2977_v10 = vadd.f32 %v2976_v63, %v5381_v19 }
 0x755   :  { %3056 = vst [vmem:[%s5513_s2 + $0xa8] sm:$0xff] %v2982_v29 }
 0x756   :  { %3055 = vst [vmem:[%s5513_s2 + $0xa0] sm:$0xff] %v2977_v10 }
 0x75a   :  { %v3935_v35 = vpop.f32.mrb[166].mxu0 }
 0x75b   :  { %v2992_v48 = vadd.f32 %v3935_v35, %v5381_v19  ;;  %v2986_v18 = vpop.f32.mrb[167].mxu0 }
 0x75c   :  { %v2987_v52 = vadd.f32 %v2986_v18, %v5381_v19 }
 0x75d   :  { %3058 = vst [vmem:[%s5513_s2 + $0xb8] sm:$0xff] %v2992_v48 }
 0x75e   :  { %3057 = vst [vmem:[%s5513_s2 + $0xb0] sm:$0xff] %v2987_v52  ;;  %v3938_v31 = vpop.f32.mrb[168].mxu0 }
 0x75f   :  { %v3002_v51 = vadd.f32 %v3938_v31, %v5381_v19  ;;  %v2996_v40 = vpop.f32.mrb[169].mxu0 }
 0x760   :  { %v2997_v55 = vadd.f32 %v2996_v40, %v5381_v19 }
 0x761   :  { %3060 = vst [vmem:[%s5513_s2 + $0xc8] sm:$0xff] %v3002_v51 }
 0x762   :  { %3059 = vst [vmem:[%s5513_s2 + $0xc0] sm:$0xff] %v2997_v55  ;;  %v3941_v47 = vpop.f32.mrb[170].mxu0 }
 0x763   :  { %v3012_v46 = vadd.f32 %v3941_v47, %v5381_v19  ;;  %v3006_v62 = vpop.f32.mrb[171].mxu0 }
 0x764   :  { %v3007_v44 = vadd.f32 %v3006_v62, %v5381_v19 }
 0x765   :  { %3062 = vst [vmem:[%s5513_s2 + $0xd8] sm:$0xff] %v3012_v46 }
 0x766   :  { %3061 = vst [vmem:[%s5513_s2 + $0xd0] sm:$0xff] %v3007_v44  ;;  %v3944_v27 = vpop.f32.mrb[172].mxu0 }
 0x767   :  { %v3022_v6 = vadd.f32 %v3944_v27, %v5381_v19  ;;  %v3016_v2 = vpop.f32.mrb[173].mxu0 }
 0x768   :  { %v3017_v11 = vadd.f32 %v3016_v2, %v5381_v19 }
 0x769   :  { %3064 = vst [vmem:[%s5513_s2 + $0xe8] sm:$0xff] %v3022_v6 }
 0x76a   :  { %3063 = vst [vmem:[%s5513_s2 + $0xe0] sm:$0xff] %v3017_v11  ;;  %v3947_v53 = vpop.f32.mrb[174].mxu0 }
 0x76b   :  { %v3032_v54 = vadd.f32 %v3947_v53, %v5381_v19  ;;  %v3026_v13 = vpop.f32.mrb[175].mxu0 }
 0x76c   :  { %v3027_v1 = vadd.f32 %v3026_v13, %v5381_v19 }
 0x76d   :  { %3066 = vst [vmem:[%s5513_s2 + $0xf8] sm:$0xff] %v3032_v54 }
 0x76e   :  { %3065 = vst [vmem:[%s5513_s2 + $0xf0] sm:$0xff] %v3027_v1 }
 0x76f   :  { %3071 = vsyncpa [#allocation3], 1 }

</bundles_post_ra>
